<compile_context>
chip_gen: v6e
topology: v6e:2x2x1
jax: 0.10.0
libtpu: 0.0.40
codegen_flags: <defaults>
</compile_context>

<pallas_src>
import math

import jax
import jax.numpy as jnp
from jax import lax
from jax.experimental import pallas as pl
from jax.experimental.pallas import tpu as pltpu

# ----------------------------- tiny-BERT config -----------------------------
VOCAB_SIZE = 100
MAX_POS = 16
TYPE_VOCAB = 2
HIDDEN = 32                      # real hidden width
NUM_HEADS = 2
HEAD_DIM = HIDDEN // NUM_HEADS
INTERMEDIATE = 64                # real FFN width
NUM_LAYERS = 2
NUM_LABELS = 2
LN_EPS = 1e-12

BATCH = 2
SEQ = 8                          # BATCH*SEQ must be a multiple of 8 (sublane tile)

HP = 128                         # padded hidden width (lane dim)
IP = 128                         # padded intermediate width

# ------------------------- packed-slab column layout -------------------------
# Weight slab: (HP, CW) bf16.  Per layer (width LW = 10*HP = 1280 columns):
#   [0    : 6*HP)  fused QKV, head-major [Q_h | K_h | V_h] (each 128 wide,
#                  real data in lanes [0:HEAD_DIM); 1/sqrt(d) folded into Q)
#   [6*HP : 8*HP)  per-head output projection (rows [0:HEAD_DIM) real)
#   [8*HP : 9*HP)  FFN up   (intermediate)
#   [9*HP :10*HP)  FFN down
# followed by pooler (HP) and classifier (HP).
LW = 10 * HP
CW = NUM_LAYERS * LW + 2 * HP

# Bias/LN slab: (1, CB) f32.  [emb_ln_g | emb_ln_b] then per layer (LB = 13*HP):
#   qkv_b(6*HP) | o_b | attn_ln_g | attn_ln_b | i_b | f_b | ffn_ln_g | ffn_ln_b
# followed by pool_b and cls_b.
LB = 13 * HP
CB = 2 * HP + NUM_LAYERS * LB + 2 * HP


# ------------------------------ shared helpers --------------------------------
def _gelu_tanh(y):
    # TODO(synk): HF bert uses erf-based GELU; tanh approximation used here.
    return 0.5 * y * (1.0 + jnp.tanh(0.7978845608028654 * (y + 0.044715 * y * y * y)))


def _mm(x, w_bf16):
    # bf16 MXU inputs, f32 accumulation.
    return jnp.dot(x.astype(jnp.bfloat16), w_bf16, preferred_element_type=jnp.float32)


# ------------------------------- fused kernel --------------------------------
def _bert_fused_kernel(x_ref, mask_ref, w_ref, b_ref, out_ref):
    """Whole BERT forward in one invocation over the (B*S, HP) activation slab."""
    # Lane-validity mask so LayerNorm statistics only cover the real HIDDEN dims.
    valid = (lax.broadcasted_iota(jnp.int32, (1, HP), 1) < HIDDEN).astype(jnp.float32)

    def ln(y, goff):
        """LayerNorm over the real hidden width; gamma at goff, beta at goff+HP.

        gamma/beta are zero in padding lanes, so the output keeps the
        zero-padding-lane invariant.
        """
        gamma = b_ref[0:1, goff:goff + HP]
        beta = b_ref[0:1, goff + HP:goff + 2 * HP]
        mean = jnp.sum(y, axis=-1, keepdims=True) * (1.0 / HIDDEN)
        d = (y - mean) * valid                       # two-pass variance, padding masked
        var = jnp.sum(d * d, axis=-1, keepdims=True) * (1.0 / HIDDEN)
        return d * lax.rsqrt(var + LN_EPS) * gamma + beta

    mask = mask_ref[...]                             # (BS, BS) block-diag + padding mask
    hidden = ln(x_ref[...], 0)                       # embedding LayerNorm, (BS, HP)

    for l in range(NUM_LAYERS):                      # unrolled
        wo = l * LW
        bo = 2 * HP + l * LB

        # ---- fused Q|K|V projection: one lane-dense (BS,128)x(128,768) matmul ----
        qkv = _mm(hidden, w_ref[:, wo:wo + 6 * HP]) + b_ref[0:1, bo:bo + 6 * HP]

        attn_out = None
        for h in range(NUM_HEADS):                   # 128-lane-aligned head slices
            hb = h * 3 * HP
            q = qkv[:, hb:hb + HP]                   # real data in lanes [0:HEAD_DIM)
            k = qkv[:, hb + HP:hb + 2 * HP]
            v = qkv[:, hb + 2 * HP:hb + 3 * HP]
            s = lax.dot_general(q.astype(jnp.bfloat16), k.astype(jnp.bfloat16),
                                (((1,), (1,)), ((), ())),
                                preferred_element_type=jnp.float32)     # (BS, BS)
            s = s + mask
            m = jnp.max(s, axis=-1, keepdims=True)
            p = jnp.exp(s - m)
            p = p * pl.reciprocal(jnp.sum(p, axis=-1, keepdims=True), approx=True)
            ctx = jnp.dot(p.astype(jnp.bfloat16), v.astype(jnp.bfloat16),
                          preferred_element_type=jnp.float32)           # (BS, HP)
            # per-head output projection accumulated in-place (no concat / zero-pad)
            contrib = _mm(ctx, w_ref[:, wo + 6 * HP + h * HP:wo + 6 * HP + (h + 1) * HP])
            attn_out = contrib if attn_out is None else attn_out + contrib

        attn_out = attn_out + b_ref[0:1, bo + 6 * HP:bo + 7 * HP]
        hidden = ln(attn_out + hidden, bo + 7 * HP)

        # ---- feed-forward block ----
        inter = _gelu_tanh(_mm(hidden, w_ref[:, wo + 8 * HP:wo + 9 * HP])
                           + b_ref[0:1, bo + 9 * HP:bo + 10 * HP])
        ffn = (_mm(inter, w_ref[:, wo + 9 * HP:wo + 10 * HP])
               + b_ref[0:1, bo + 10 * HP:bo + 11 * HP])
        hidden = ln(ffn + hidden, bo + 11 * HP)

    # ---- pooler (tanh dense) + classifier, computed for every row; the wrapper
    #      picks out the [CLS] rows.  Extra rows are negligible MXU work and keep the
    #      output store lane-dense (BS x 128).
    po = NUM_LAYERS * LW
    pb = 2 * HP + NUM_LAYERS * LB
    pooled = jnp.tanh(_mm(hidden, w_ref[:, po:po + HP]) + b_ref[0:1, pb:pb + HP])
    logits = _mm(pooled, w_ref[:, po + HP:po + 2 * HP]) + b_ref[0:1, pb + HP:pb + 2 * HP]
    out_ref[...] = logits


# ------------------------------ parameter init -------------------------------
def init_raw_params(key):
    def nrm(k, shape):
        return 0.02 * jax.random.normal(k, shape, dtype=jnp.float32)

    keys = iter(jax.random.split(key, 3 + 6 * NUM_LAYERS + 2))
    raw = {
        "word_emb": nrm(next(keys), (VOCAB_SIZE, HIDDEN)),
        "pos_emb": nrm(next(keys), (MAX_POS, HIDDEN)),
        "type_emb": nrm(next(keys), (TYPE_VOCAB, HIDDEN)),
        "emb_ln_g": jnp.ones((HIDDEN,), jnp.float32),
        "emb_ln_b": jnp.zeros((HIDDEN,), jnp.float32),
        "layers": [],
    }
    for _ in range(NUM_LAYERS):
        raw["layers"].append({
            "q_w": nrm(next(keys), (HIDDEN, HIDDEN)), "q_b": jnp.zeros((HIDDEN,), jnp.float32),
            "k_w": nrm(next(keys), (HIDDEN, HIDDEN)), "k_b": jnp.zeros((HIDDEN,), jnp.float32),
            "v_w": nrm(next(keys), (HIDDEN, HIDDEN)), "v_b": jnp.zeros((HIDDEN,), jnp.float32),
            "o_w": nrm(next(keys), (HIDDEN, HIDDEN)), "o_b": jnp.zeros((HIDDEN,), jnp.float32),
            "attn_ln_g": jnp.ones((HIDDEN,), jnp.float32),
            "attn_ln_b": jnp.zeros((HIDDEN,), jnp.float32),
            "i_w": nrm(next(keys), (HIDDEN, INTERMEDIATE)),
            "i_b": jnp.zeros((INTERMEDIATE,), jnp.float32),
            "f_w": nrm(next(keys), (INTERMEDIATE, HIDDEN)),
            "f_b": jnp.zeros((HIDDEN,), jnp.float32),
            "ffn_ln_g": jnp.ones((HIDDEN,), jnp.float32),
            "ffn_ln_b": jnp.zeros((HIDDEN,), jnp.float32),
        })
    raw["pool_w"] = nrm(next(keys), (HIDDEN, HIDDEN))
    raw["pool_b"] = jnp.zeros((HIDDEN,), jnp.float32)
    raw["cls_w"] = nrm(next(keys), (HIDDEN, NUM_LABELS))
    raw["cls_b"] = jnp.zeros((NUM_LABELS,), jnp.float32)
    return raw


def _pad_block(w):
    """Pad a 2-D weight into a (HP, HP) block (zeros elsewhere)."""
    return jnp.zeros((HP, HP), jnp.float32).at[:w.shape[0], :w.shape[1]].set(w)


def _pad_vec(v):
    return jnp.zeros((HP,), jnp.float32).at[:v.shape[0]].set(v)


def _assert_pad_invariant(b_slab):
    """LN gamma/beta must be zero in padding lanes or the zero-lane invariant breaks."""
    ln_offs = [0, HP]
    for l in range(NUM_LAYERS):
        bo = 2 * HP + l * LB
        ln_offs += [bo + 7 * HP, bo + 8 * HP, bo + 11 * HP, bo + 12 * HP]
    for off in ln_offs:
        assert bool(jnp.all(b_slab[0, off + HIDDEN:off + HP] == 0.0)), off


def pack_params(raw):
    """Pack all matmul weights into one bf16 slab and all biases/LN params into one
    f32 slab, per the column layout documented above."""
    scale = 1.0 / math.sqrt(HEAD_DIM)
    w_cols = []
    b_cols = [_pad_vec(raw["emb_ln_g"]), _pad_vec(raw["emb_ln_b"])]

    for lyr in raw["layers"]:
        # fused QKV, head-major, each head's Q/K/V on its own 128-lane boundary;
        # attention scale folded into the Q weight and bias.
        for h in range(NUM_HEADS):
            sl = slice(h * HEAD_DIM, (h + 1) * HEAD_DIM)
            w_cols += [_pad_block(lyr["q_w"][:, sl] * scale),
                       _pad_block(lyr["k_w"][:, sl]),
                       _pad_block(lyr["v_w"][:, sl])]
            b_cols += [_pad_vec(lyr["q_b"][sl] * scale),
                       _pad_vec(lyr["k_b"][sl]),
                       _pad_vec(lyr["v_b"][sl])]
        # per-head output projection (rows [0:HEAD_DIM) hold that head's o_w rows)
        for h in range(NUM_HEADS):
            w_cols.append(jnp.zeros((HP, HP), jnp.float32)
                          .at[:HEAD_DIM, :HIDDEN]
                          .set(lyr["o_w"][h * HEAD_DIM:(h + 1) * HEAD_DIM, :]))
        w_cols += [_pad_block(lyr["i_w"]), _pad_block(lyr["f_w"])]
        b_cols += [_pad_vec(lyr["o_b"]),
                   _pad_vec(lyr["attn_ln_g"]), _pad_vec(lyr["attn_ln_b"]),
                   _pad_vec(lyr["i_b"]), _pad_vec(lyr["f_b"]),
                   _pad_vec(lyr["ffn_ln_g"]), _pad_vec(lyr["ffn_ln_b"])]

    w_cols += [_pad_block(raw["pool_w"]), _pad_block(raw["cls_w"])]
    b_cols += [_pad_vec(raw["pool_b"]), _pad_vec(raw["cls_b"])]

    w_slab = jnp.concatenate(w_cols, axis=1).astype(jnp.bfloat16)      # (HP, CW)
    b_slab = jnp.concatenate(b_cols)[None, :]                          # (1, CB)
    assert w_slab.shape == (HP, CW) and b_slab.shape == (1, CB)
    _assert_pad_invariant(b_slab)
    return {"word_emb": raw["word_emb"], "pos_emb": raw["pos_emb"],
            "type_emb": raw["type_emb"], "w_slab": w_slab, "b_slab": b_slab}


# -------------------------------- forward pass --------------------------------
def surrogate_forward(params, input_ids, attention_mask):
    B, S = input_ids.shape
    BS = B * S

    # Glue in plain JAX: embedding gathers + lane padding to 128.
    word = params["word_emb"][input_ids]                     # (B, S, HIDDEN)
    pos = params["pos_emb"][:S][None, :, :]
    typ = params["type_emb"][0][None, None, :]               # token_type_ids == 0
    emb = (word + pos + typ).reshape(BS, HIDDEN)
    emb_p = jnp.zeros((BS, HP), jnp.float32).at[:, :HIDDEN].set(emb)

    # Block-diagonal (per-batch) + key-padding additive mask, built once and hoisted
    # out of the per-head/per-layer loops.  exp(-1e4) underflows to exactly 0 in f32,
    # so one (BS,BS) softmax equals the per-batch softmax of the reference model.
    batch_of = jnp.arange(BS) // S
    same_batch = (batch_of[:, None] == batch_of[None, :]).astype(jnp.float32)
    key_valid = attention_mask.reshape(BS).astype(jnp.float32)
    mask_add = (1.0 - same_batch * key_valid[None, :]) * -10000.0       # (BS, BS)

    out = pl.pallas_call(
        _bert_fused_kernel,
        out_shape=jax.ShapeDtypeStruct((BS, HP), jnp.float32),
        grid=(1,),                                                       # single invocation
        in_specs=[
            pl.BlockSpec((BS, HP), lambda i: (0, 0)),                    # embeddings slab
            pl.BlockSpec((BS, BS), lambda i: (0, 0)),                    # additive mask
            pl.BlockSpec((HP, CW), lambda i: (0, 0)),                    # bf16 weight slab
            pl.BlockSpec((1, CB), lambda i: (0, 0)),                     # f32 bias/LN slab
        ],
        out_specs=pl.BlockSpec((BS, HP), lambda i: (0, 0)),              # lane-dense logits
        compiler_params=pltpu.CompilerParams(dimension_semantics=("arbitrary",)),
    )(emb_p, mask_add, params["w_slab"], params["b_slab"])

    # [CLS] row of each batch element, real label lanes only.
    return out[0::S, :NUM_LABELS]


# ---------------------- pure-JAX reference (for validation) -------------------
def _ln_ref(y, g, b):
    mean = jnp.mean(y, axis=-1, keepdims=True)
    var = jnp.mean((y - mean) ** 2, axis=-1, keepdims=True)
    return (y - mean) * lax.rsqrt(var + LN_EPS) * g + b


def reference_forward(raw, input_ids, attention_mask):
    B, S = input_ids.shape
    word = raw["word_emb"][input_ids]
    pos = raw["pos_emb"][:S][None]
    typ = raw["type_emb"][0][None, None]
    h = _ln_ref(word + pos + typ, raw["emb_ln_g"], raw["emb_ln_b"])
    mask = (1.0 - attention_mask.astype(jnp.float32)) * -10000.0

    def split(x):
        return x.reshape(B, S, NUM_HEADS, HEAD_DIM).transpose(0, 2, 1, 3)

    for lyr in raw["layers"]:
        q = h @ lyr["q_w"] + lyr["q_b"]
        k = h @ lyr["k_w"] + lyr["k_b"]
        v = h @ lyr["v_w"] + lyr["v_b"]
        s = jnp.einsum("bhqd,bhkd->bhqk", split(q), split(k)) / math.sqrt(HEAD_DIM)
        s = s + mask[:, None, None, :]
        p = jax.nn.softmax(s, axis=-1)
        ctx = (jnp.einsum("bhqk,bhkd->bhqd", p, split(v))
               .transpose(0, 2, 1, 3).reshape(B, S, HIDDEN))
        h = _ln_ref(ctx @ lyr["o_w"] + lyr["o_b"] + h, lyr["attn_ln_g"], lyr["attn_ln_b"])
        inter = _gelu_tanh(h @ lyr["i_w"] + lyr["i_b"])
        h = _ln_ref(inter @ lyr["f_w"] + lyr["f_b"] + h, lyr["ffn_ln_g"], lyr["ffn_ln_b"])
    pooled = jnp.tanh(h[:, 0, :] @ raw["pool_w"] + raw["pool_b"])
    return pooled @ raw["cls_w"] + raw["cls_b"]


# ------------------------------------ main ------------------------------------
if __name__ == "__main__":
    key = jax.random.PRNGKey(0)
    pkey, idkey = jax.random.split(key)
    raw_params = init_raw_params(pkey)
    packed_params = pack_params(raw_params)

    input_ids = jax.random.randint(idkey, (BATCH, SEQ), 0, VOCAB_SIZE, dtype=jnp.int32)
    attention_mask = jnp.ones((BATCH, SEQ), dtype=jnp.int32).at[1, SEQ - 2:].set(0)

    logits = jax.jit(surrogate_forward)(packed_params, input_ids, attention_mask)
    logits = jax.block_until_ready(logits)

    assert logits.shape == (BATCH, NUM_LABELS)
    assert bool(jnp.all(jnp.isfinite(logits)))

    ref_logits = reference_forward(raw_params, input_ids, attention_mask)
    assert bool(jnp.allclose(logits, ref_logits, atol=5e-3, rtol=5e-3)), (logits, ref_logits)

    print("KERNEL_OK")
</pallas_src>

<mosaic_0001>
module attributes {stable_mosaic.version = 11 : i64} {
  func.func @_bert_fused_kernel(%arg0: i32, %arg1: memref<16x128xf32, #tpu.memory_space<vmem>>, %arg2: memref<16x16xf32, #tpu.memory_space<vmem>>, %arg3: memref<128x2816xbf16, #tpu.memory_space<vmem>>, %arg4: memref<1x3840xf32, #tpu.memory_space<vmem>>, %arg5: memref<16x128xf32, #tpu.memory_space<vmem>>) attributes {dimension_semantics = [#tpu.dimension_semantics<arbitrary>], iteration_bounds = array<i64: 1>, scalar_prefetch = 0 : i64, scratch_operands = 0 : i64, tpu.core_type = #tpu.core_type<tc>, window_params = [{pipeline_mode = #tpu.pipeline_mode<synchronous>, transform_indices = @transform_0, window_bounds = array<i64: 16, 128>}, {pipeline_mode = #tpu.pipeline_mode<synchronous>, transform_indices = @transform_1, window_bounds = array<i64: 16, 16>}, {pipeline_mode = #tpu.pipeline_mode<synchronous>, transform_indices = @transform_2, window_bounds = array<i64: 128, 2816>}, {pipeline_mode = #tpu.pipeline_mode<synchronous>, transform_indices = @transform_3, window_bounds = array<i64: 1, 3840>}, {pipeline_mode = #tpu.pipeline_mode<synchronous>, transform_indices = @transform_4, window_bounds = array<i64: 16, 128>}]} {
    %0 = tpu.iota {dimensions = array<i32: 1>} : vector<1x128xi32>
    %c32_i32 = arith.constant 32 : i32
    %1 = vector.broadcast %c32_i32 : i32 to vector<1x128xi32>
    %2 = arith.cmpi slt, %0, %1 : vector<1x128xi32>
    %3 = arith.extui %2 : vector<1x128xi1> to vector<1x128xi32>
    %4 = arith.sitofp %3 : vector<1x128xi32> to vector<1x128xf32>
    %c0 = arith.constant 0 : index
    %c0_0 = arith.constant 0 : index
    %5 = vector.load %arg2[%c0, %c0_0] : memref<16x16xf32, #tpu.memory_space<vmem>>, vector<16x16xf32>
    %c0_1 = arith.constant 0 : index
    %c0_2 = arith.constant 0 : index
    %6 = vector.load %arg1[%c0_1, %c0_2] : memref<16x128xf32, #tpu.memory_space<vmem>>, vector<16x128xf32>
    %c0_3 = arith.constant 0 : index
    %c0_4 = arith.constant 0 : index
    %7 = vector.load %arg4[%c0_3, %c0_4] : memref<1x3840xf32, #tpu.memory_space<vmem>>, vector<1x128xf32>
    %c0_5 = arith.constant 0 : index
    %c128 = arith.constant 128 : index
    %8 = vector.load %arg4[%c0_5, %c128] : memref<1x3840xf32, #tpu.memory_space<vmem>>, vector<1x128xf32>
    %cst = arith.constant dense<0.000000e+00> : vector<16xf32>
    %9 = vector.multi_reduction <add>, %6, %cst [1] : vector<16x128xf32> to vector<16xf32>
    %10 = vector.shape_cast %9 : vector<16xf32> to vector<16x1xf32>
    %cst_6 = arith.constant 3.125000e-02 : f32
    %11 = vector.broadcast %cst_6 : f32 to vector<16x1xf32>
    %12 = arith.mulf %10, %11 : vector<16x1xf32>
    %13 = vector.broadcast %12 : vector<16x1xf32> to vector<16x128xf32>
    %14 = arith.subf %6, %13 : vector<16x128xf32>
    %15 = vector.broadcast %4 : vector<1x128xf32> to vector<16x128xf32>
    %16 = arith.mulf %14, %15 : vector<16x128xf32>
    %17 = arith.mulf %16, %16 : vector<16x128xf32>
    %cst_7 = arith.constant dense<0.000000e+00> : vector<16xf32>
    %18 = vector.multi_reduction <add>, %17, %cst_7 [1] : vector<16x128xf32> to vector<16xf32>
    %19 = vector.shape_cast %18 : vector<16xf32> to vector<16x1xf32>
    %cst_8 = arith.constant 3.125000e-02 : f32
    %20 = vector.broadcast %cst_8 : f32 to vector<16x1xf32>
    %21 = arith.mulf %19, %20 : vector<16x1xf32>
    %cst_9 = arith.constant 9.99999996E-13 : f32
    %22 = vector.broadcast %cst_9 : f32 to vector<16x1xf32>
    %23 = arith.addf %21, %22 : vector<16x1xf32>
    %24 = math.rsqrt %23 : vector<16x1xf32>
    %25 = vector.broadcast %24 : vector<16x1xf32> to vector<16x128xf32>
    %26 = arith.mulf %16, %25 : vector<16x128xf32>
    %27 = vector.broadcast %7 : vector<1x128xf32> to vector<16x128xf32>
    %28 = arith.mulf %26, %27 : vector<16x128xf32>
    %29 = vector.broadcast %8 : vector<1x128xf32> to vector<16x128xf32>
    %30 = arith.addf %28, %29 : vector<16x128xf32>
    %c0_10 = arith.constant 0 : index
    %c0_11 = arith.constant 0 : index
    %31 = vector.load %arg3[%c0_10, %c0_11] : memref<128x2816xbf16, #tpu.memory_space<vmem>>, vector<128x768xbf16>
    %32 = arith.truncf %30 : vector<16x128xf32> to vector<16x128xbf16>
    %cst_12 = arith.constant dense<0.000000e+00> : vector<16x768xf32>
    %33 = tpu.matmul %32, %31, %cst_12 {dimension_numbers = #tpu.dot_dimension_numbers<[1], [0], [0], [1], [0, 0, 1, 1], [], []>} : vector<16x128xbf16>, vector<128x768xbf16>, vector<16x768xf32> -> vector<16x768xf32>
    %c0_13 = arith.constant 0 : index
    %c256 = arith.constant 256 : index
    %34 = vector.load %arg4[%c0_13, %c256] : memref<1x3840xf32, #tpu.memory_space<vmem>>, vector<1x768xf32>
    %35 = vector.broadcast %34 : vector<1x768xf32> to vector<16x768xf32>
    %36 = arith.addf %33, %35 : vector<16x768xf32>
    %37 = vector.extract_strided_slice %36 {offsets = [0, 0], sizes = [16, 128], strides = [1, 1]} : vector<16x768xf32> to vector<16x128xf32>
    %38 = vector.extract_strided_slice %36 {offsets = [0, 128], sizes = [16, 128], strides = [1, 1]} : vector<16x768xf32> to vector<16x128xf32>
    %39 = vector.extract_strided_slice %36 {offsets = [0, 256], sizes = [16, 128], strides = [1, 1]} : vector<16x768xf32> to vector<16x128xf32>
    %40 = arith.truncf %37 : vector<16x128xf32> to vector<16x128xbf16>
    %41 = arith.truncf %38 : vector<16x128xf32> to vector<16x128xbf16>
    %cst_14 = arith.constant dense<0.000000e+00> : vector<16x16xf32>
    %42 = tpu.matmul %40, %41, %cst_14 {dimension_numbers = #tpu.dot_dimension_numbers<[1], [1], [0], [0], [0, 0, 1, 0], [], []>} : vector<16x128xbf16>, vector<16x128xbf16>, vector<16x16xf32> -> vector<16x16xf32>
    %43 = arith.addf %42, %5 : vector<16x16xf32>
    %cst_15 = arith.constant dense<0xFF800000> : vector<16xf32>
    %44 = vector.multi_reduction <maximumf>, %43, %cst_15 [1] : vector<16x16xf32> to vector<16xf32>
    %45 = vector.shape_cast %44 : vector<16xf32> to vector<16x1xf32>
    %46 = vector.broadcast %45 : vector<16x1xf32> to vector<16x16xf32>
    %47 = arith.subf %43, %46 : vector<16x16xf32>
    %48 = math.exp %47 : vector<16x16xf32>
    %cst_16 = arith.constant dense<0.000000e+00> : vector<16xf32>
    %49 = vector.multi_reduction <add>, %48, %cst_16 [1] : vector<16x16xf32> to vector<16xf32>
    %50 = vector.shape_cast %49 : vector<16xf32> to vector<16x1xf32>
    %51 = tpu.reciprocal %50 {approx = true} : vector<16x1xf32> -> vector<16x1xf32>
    %52 = vector.broadcast %51 : vector<16x1xf32> to vector<16x16xf32>
    %53 = arith.mulf %48, %52 : vector<16x16xf32>
    %54 = arith.truncf %53 : vector<16x16xf32> to vector<16x16xbf16>
    %55 = arith.truncf %39 : vector<16x128xf32> to vector<16x128xbf16>
    %cst_17 = arith.constant dense<0.000000e+00> : vector<16x128xf32>
    %56 = tpu.matmul %54, %55, %cst_17 {dimension_numbers = #tpu.dot_dimension_numbers<[1], [0], [0], [1], [0, 0, 1, 1], [], []>} : vector<16x16xbf16>, vector<16x128xbf16>, vector<16x128xf32> -> vector<16x128xf32>
    %c0_18 = arith.constant 0 : index
    %c768 = arith.constant 768 : index
    %57 = vector.load %arg3[%c0_18, %c768] : memref<128x2816xbf16, #tpu.memory_space<vmem>>, vector<128x128xbf16>
    %58 = arith.truncf %56 : vector<16x128xf32> to vector<16x128xbf16>
    %cst_19 = arith.constant dense<0.000000e+00> : vector<16x128xf32>
    %59 = tpu.matmul %58, %57, %cst_19 {dimension_numbers = #tpu.dot_dimension_numbers<[1], [0], [0], [1], [0, 0, 1, 1], [], []>} : vector<16x128xbf16>, vector<128x128xbf16>, vector<16x128xf32> -> vector<16x128xf32>
    %60 = vector.extract_strided_slice %36 {offsets = [0, 384], sizes = [16, 128], strides = [1, 1]} : vector<16x768xf32> to vector<16x128xf32>
    %61 = vector.extract_strided_slice %36 {offsets = [0, 512], sizes = [16, 128], strides = [1, 1]} : vector<16x768xf32> to vector<16x128xf32>
    %62 = vector.extract_strided_slice %36 {offsets = [0, 640], sizes = [16, 128], strides = [1, 1]} : vector<16x768xf32> to vector<16x128xf32>
    %63 = arith.truncf %60 : vector<16x128xf32> to vector<16x128xbf16>
    %64 = arith.truncf %61 : vector<16x128xf32> to vector<16x128xbf16>
    %cst_20 = arith.constant dense<0.000000e+00> : vector<16x16xf32>
    %65 = tpu.matmul %63, %64, %cst_20 {dimension_numbers = #tpu.dot_dimension_numbers<[1], [1], [0], [0], [0, 0, 1, 0], [], []>} : vector<16x128xbf16>, vector<16x128xbf16>, vector<16x16xf32> -> vector<16x16xf32>
    %66 = arith.addf %65, %5 : vector<16x16xf32>
    %cst_21 = arith.constant dense<0xFF800000> : vector<16xf32>
    %67 = vector.multi_reduction <maximumf>, %66, %cst_21 [1] : vector<16x16xf32> to vector<16xf32>
    %68 = vector.shape_cast %67 : vector<16xf32> to vector<16x1xf32>
    %69 = vector.broadcast %68 : vector<16x1xf32> to vector<16x16xf32>
    %70 = arith.subf %66, %69 : vector<16x16xf32>
    %71 = math.exp %70 : vector<16x16xf32>
    %cst_22 = arith.constant dense<0.000000e+00> : vector<16xf32>
    %72 = vector.multi_reduction <add>, %71, %cst_22 [1] : vector<16x16xf32> to vector<16xf32>
    %73 = vector.shape_cast %72 : vector<16xf32> to vector<16x1xf32>
    %74 = tpu.reciprocal %73 {approx = true} : vector<16x1xf32> -> vector<16x1xf32>
    %75 = vector.broadcast %74 : vector<16x1xf32> to vector<16x16xf32>
    %76 = arith.mulf %71, %75 : vector<16x16xf32>
    %77 = arith.truncf %76 : vector<16x16xf32> to vector<16x16xbf16>
    %78 = arith.truncf %62 : vector<16x128xf32> to vector<16x128xbf16>
    %cst_23 = arith.constant dense<0.000000e+00> : vector<16x128xf32>
    %79 = tpu.matmul %77, %78, %cst_23 {dimension_numbers = #tpu.dot_dimension_numbers<[1], [0], [0], [1], [0, 0, 1, 1], [], []>} : vector<16x16xbf16>, vector<16x128xbf16>, vector<16x128xf32> -> vector<16x128xf32>
    %c0_24 = arith.constant 0 : index
    %c896 = arith.constant 896 : index
    %80 = vector.load %arg3[%c0_24, %c896] : memref<128x2816xbf16, #tpu.memory_space<vmem>>, vector<128x128xbf16>
    %81 = arith.truncf %79 : vector<16x128xf32> to vector<16x128xbf16>
    %cst_25 = arith.constant dense<0.000000e+00> : vector<16x128xf32>
    %82 = tpu.matmul %81, %80, %cst_25 {dimension_numbers = #tpu.dot_dimension_numbers<[1], [0], [0], [1], [0, 0, 1, 1], [], []>} : vector<16x128xbf16>, vector<128x128xbf16>, vector<16x128xf32> -> vector<16x128xf32>
    %83 = arith.addf %59, %82 : vector<16x128xf32>
    %c0_26 = arith.constant 0 : index
    %c1024 = arith.constant 1024 : index
    %84 = vector.load %arg4[%c0_26, %c1024] : memref<1x3840xf32, #tpu.memory_space<vmem>>, vector<1x128xf32>
    %85 = vector.broadcast %84 : vector<1x128xf32> to vector<16x128xf32>
    %86 = arith.addf %83, %85 : vector<16x128xf32>
    %87 = arith.addf %86, %30 : vector<16x128xf32>
    %c0_27 = arith.constant 0 : index
    %c1152 = arith.constant 1152 : index
    %88 = vector.load %arg4[%c0_27, %c1152] : memref<1x3840xf32, #tpu.memory_space<vmem>>, vector<1x128xf32>
    %c0_28 = arith.constant 0 : index
    %c1280 = arith.constant 1280 : index
    %89 = vector.load %arg4[%c0_28, %c1280] : memref<1x3840xf32, #tpu.memory_space<vmem>>, vector<1x128xf32>
    %cst_29 = arith.constant dense<0.000000e+00> : vector<16xf32>
    %90 = vector.multi_reduction <add>, %87, %cst_29 [1] : vector<16x128xf32> to vector<16xf32>
    %91 = vector.shape_cast %90 : vector<16xf32> to vector<16x1xf32>
    %cst_30 = arith.constant 3.125000e-02 : f32
    %92 = vector.broadcast %cst_30 : f32 to vector<16x1xf32>
    %93 = arith.mulf %91, %92 : vector<16x1xf32>
    %94 = vector.broadcast %93 : vector<16x1xf32> to vector<16x128xf32>
    %95 = arith.subf %87, %94 : vector<16x128xf32>
    %96 = vector.broadcast %4 : vector<1x128xf32> to vector<16x128xf32>
    %97 = arith.mulf %95, %96 : vector<16x128xf32>
    %98 = arith.mulf %97, %97 : vector<16x128xf32>
    %cst_31 = arith.constant dense<0.000000e+00> : vector<16xf32>
    %99 = vector.multi_reduction <add>, %98, %cst_31 [1] : vector<16x128xf32> to vector<16xf32>
    %100 = vector.shape_cast %99 : vector<16xf32> to vector<16x1xf32>
    %cst_32 = arith.constant 3.125000e-02 : f32
    %101 = vector.broadcast %cst_32 : f32 to vector<16x1xf32>
    %102 = arith.mulf %100, %101 : vector<16x1xf32>
    %cst_33 = arith.constant 9.99999996E-13 : f32
    %103 = vector.broadcast %cst_33 : f32 to vector<16x1xf32>
    %104 = arith.addf %102, %103 : vector<16x1xf32>
    %105 = math.rsqrt %104 : vector<16x1xf32>
    %106 = vector.broadcast %105 : vector<16x1xf32> to vector<16x128xf32>
    %107 = arith.mulf %97, %106 : vector<16x128xf32>
    %108 = vector.broadcast %88 : vector<1x128xf32> to vector<16x128xf32>
    %109 = arith.mulf %107, %108 : vector<16x128xf32>
    %110 = vector.broadcast %89 : vector<1x128xf32> to vector<16x128xf32>
    %111 = arith.addf %109, %110 : vector<16x128xf32>
    %c0_34 = arith.constant 0 : index
    %c1024_35 = arith.constant 1024 : index
    %112 = vector.load %arg3[%c0_34, %c1024_35] : memref<128x2816xbf16, #tpu.memory_space<vmem>>, vector<128x128xbf16>
    %113 = arith.truncf %111 : vector<16x128xf32> to vector<16x128xbf16>
    %cst_36 = arith.constant dense<0.000000e+00> : vector<16x128xf32>
    %114 = tpu.matmul %113, %112, %cst_36 {dimension_numbers = #tpu.dot_dimension_numbers<[1], [0], [0], [1], [0, 0, 1, 1], [], []>} : vector<16x128xbf16>, vector<128x128xbf16>, vector<16x128xf32> -> vector<16x128xf32>
    %c0_37 = arith.constant 0 : index
    %c1408 = arith.constant 1408 : index
    %115 = vector.load %arg4[%c0_37, %c1408] : memref<1x3840xf32, #tpu.memory_space<vmem>>, vector<1x128xf32>
    %116 = vector.broadcast %115 : vector<1x128xf32> to vector<16x128xf32>
    %117 = arith.addf %114, %116 : vector<16x128xf32>
    %cst_38 = arith.constant 5.000000e-01 : f32
    %118 = vector.broadcast %cst_38 : f32 to vector<16x128xf32>
    %119 = arith.mulf %118, %117 : vector<16x128xf32>
    %cst_39 = arith.constant 4.471500e-02 : f32
    %120 = vector.broadcast %cst_39 : f32 to vector<16x128xf32>
    %121 = arith.mulf %120, %117 : vector<16x128xf32>
    %122 = arith.mulf %121, %117 : vector<16x128xf32>
    %123 = arith.mulf %122, %117 : vector<16x128xf32>
    %124 = arith.addf %117, %123 : vector<16x128xf32>
    %cst_40 = arith.constant 0.797884583 : f32
    %125 = vector.broadcast %cst_40 : f32 to vector<16x128xf32>
    %126 = arith.mulf %125, %124 : vector<16x128xf32>
    %127 = math.tanh %126 : vector<16x128xf32>
    %cst_41 = arith.constant 1.000000e+00 : f32
    %128 = vector.broadcast %cst_41 : f32 to vector<16x128xf32>
    %129 = arith.addf %128, %127 : vector<16x128xf32>
    %130 = arith.mulf %119, %129 : vector<16x128xf32>
    %c0_42 = arith.constant 0 : index
    %c1152_43 = arith.constant 1152 : index
    %131 = vector.load %arg3[%c0_42, %c1152_43] : memref<128x2816xbf16, #tpu.memory_space<vmem>>, vector<128x128xbf16>
    %132 = arith.truncf %130 : vector<16x128xf32> to vector<16x128xbf16>
    %cst_44 = arith.constant dense<0.000000e+00> : vector<16x128xf32>
    %133 = tpu.matmul %132, %131, %cst_44 {dimension_numbers = #tpu.dot_dimension_numbers<[1], [0], [0], [1], [0, 0, 1, 1], [], []>} : vector<16x128xbf16>, vector<128x128xbf16>, vector<16x128xf32> -> vector<16x128xf32>
    %c0_45 = arith.constant 0 : index
    %c1536 = arith.constant 1536 : index
    %134 = vector.load %arg4[%c0_45, %c1536] : memref<1x3840xf32, #tpu.memory_space<vmem>>, vector<1x128xf32>
    %135 = vector.broadcast %134 : vector<1x128xf32> to vector<16x128xf32>
    %136 = arith.addf %133, %135 : vector<16x128xf32>
    %137 = arith.addf %136, %111 : vector<16x128xf32>
    %c0_46 = arith.constant 0 : index
    %c1664 = arith.constant 1664 : index
    %138 = vector.load %arg4[%c0_46, %c1664] : memref<1x3840xf32, #tpu.memory_space<vmem>>, vector<1x128xf32>
    %c0_47 = arith.constant 0 : index
    %c1792 = arith.constant 1792 : index
    %139 = vector.load %arg4[%c0_47, %c1792] : memref<1x3840xf32, #tpu.memory_space<vmem>>, vector<1x128xf32>
    %cst_48 = arith.constant dense<0.000000e+00> : vector<16xf32>
    %140 = vector.multi_reduction <add>, %137, %cst_48 [1] : vector<16x128xf32> to vector<16xf32>
    %141 = vector.shape_cast %140 : vector<16xf32> to vector<16x1xf32>
    %cst_49 = arith.constant 3.125000e-02 : f32
    %142 = vector.broadcast %cst_49 : f32 to vector<16x1xf32>
    %143 = arith.mulf %141, %142 : vector<16x1xf32>
    %144 = vector.broadcast %143 : vector<16x1xf32> to vector<16x128xf32>
    %145 = arith.subf %137, %144 : vector<16x128xf32>
    %146 = vector.broadcast %4 : vector<1x128xf32> to vector<16x128xf32>
    %147 = arith.mulf %145, %146 : vector<16x128xf32>
    %148 = arith.mulf %147, %147 : vector<16x128xf32>
    %cst_50 = arith.constant dense<0.000000e+00> : vector<16xf32>
    %149 = vector.multi_reduction <add>, %148, %cst_50 [1] : vector<16x128xf32> to vector<16xf32>
    %150 = vector.shape_cast %149 : vector<16xf32> to vector<16x1xf32>
    %cst_51 = arith.constant 3.125000e-02 : f32
    %151 = vector.broadcast %cst_51 : f32 to vector<16x1xf32>
    %152 = arith.mulf %150, %151 : vector<16x1xf32>
    %cst_52 = arith.constant 9.99999996E-13 : f32
    %153 = vector.broadcast %cst_52 : f32 to vector<16x1xf32>
    %154 = arith.addf %152, %153 : vector<16x1xf32>
    %155 = math.rsqrt %154 : vector<16x1xf32>
    %156 = vector.broadcast %155 : vector<16x1xf32> to vector<16x128xf32>
    %157 = arith.mulf %147, %156 : vector<16x128xf32>
    %158 = vector.broadcast %138 : vector<1x128xf32> to vector<16x128xf32>
    %159 = arith.mulf %157, %158 : vector<16x128xf32>
    %160 = vector.broadcast %139 : vector<1x128xf32> to vector<16x128xf32>
    %161 = arith.addf %159, %160 : vector<16x128xf32>
    %c0_53 = arith.constant 0 : index
    %c1280_54 = arith.constant 1280 : index
    %162 = vector.load %arg3[%c0_53, %c1280_54] : memref<128x2816xbf16, #tpu.memory_space<vmem>>, vector<128x768xbf16>
    %163 = arith.truncf %161 : vector<16x128xf32> to vector<16x128xbf16>
    %cst_55 = arith.constant dense<0.000000e+00> : vector<16x768xf32>
    %164 = tpu.matmul %163, %162, %cst_55 {dimension_numbers = #tpu.dot_dimension_numbers<[1], [0], [0], [1], [0, 0, 1, 1], [], []>} : vector<16x128xbf16>, vector<128x768xbf16>, vector<16x768xf32> -> vector<16x768xf32>
    %c0_56 = arith.constant 0 : index
    %c1920 = arith.constant 1920 : index
    %165 = vector.load %arg4[%c0_56, %c1920] : memref<1x3840xf32, #tpu.memory_space<vmem>>, vector<1x768xf32>
    %166 = vector.broadcast %165 : vector<1x768xf32> to vector<16x768xf32>
    %167 = arith.addf %164, %166 : vector<16x768xf32>
    %168 = vector.extract_strided_slice %167 {offsets = [0, 0], sizes = [16, 128], strides = [1, 1]} : vector<16x768xf32> to vector<16x128xf32>
    %169 = vector.extract_strided_slice %167 {offsets = [0, 128], sizes = [16, 128], strides = [1, 1]} : vector<16x768xf32> to vector<16x128xf32>
    %170 = vector.extract_strided_slice %167 {offsets = [0, 256], sizes = [16, 128], strides = [1, 1]} : vector<16x768xf32> to vector<16x128xf32>
    %171 = arith.truncf %168 : vector<16x128xf32> to vector<16x128xbf16>
    %172 = arith.truncf %169 : vector<16x128xf32> to vector<16x128xbf16>
    %cst_57 = arith.constant dense<0.000000e+00> : vector<16x16xf32>
    %173 = tpu.matmul %171, %172, %cst_57 {dimension_numbers = #tpu.dot_dimension_numbers<[1], [1], [0], [0], [0, 0, 1, 0], [], []>} : vector<16x128xbf16>, vector<16x128xbf16>, vector<16x16xf32> -> vector<16x16xf32>
    %174 = arith.addf %173, %5 : vector<16x16xf32>
    %cst_58 = arith.constant dense<0xFF800000> : vector<16xf32>
    %175 = vector.multi_reduction <maximumf>, %174, %cst_58 [1] : vector<16x16xf32> to vector<16xf32>
    %176 = vector.shape_cast %175 : vector<16xf32> to vector<16x1xf32>
    %177 = vector.broadcast %176 : vector<16x1xf32> to vector<16x16xf32>
    %178 = arith.subf %174, %177 : vector<16x16xf32>
    %179 = math.exp %178 : vector<16x16xf32>
    %cst_59 = arith.constant dense<0.000000e+00> : vector<16xf32>
    %180 = vector.multi_reduction <add>, %179, %cst_59 [1] : vector<16x16xf32> to vector<16xf32>
    %181 = vector.shape_cast %180 : vector<16xf32> to vector<16x1xf32>
    %182 = tpu.reciprocal %181 {approx = true} : vector<16x1xf32> -> vector<16x1xf32>
    %183 = vector.broadcast %182 : vector<16x1xf32> to vector<16x16xf32>
    %184 = arith.mulf %179, %183 : vector<16x16xf32>
    %185 = arith.truncf %184 : vector<16x16xf32> to vector<16x16xbf16>
    %186 = arith.truncf %170 : vector<16x128xf32> to vector<16x128xbf16>
    %cst_60 = arith.constant dense<0.000000e+00> : vector<16x128xf32>
    %187 = tpu.matmul %185, %186, %cst_60 {dimension_numbers = #tpu.dot_dimension_numbers<[1], [0], [0], [1], [0, 0, 1, 1], [], []>} : vector<16x16xbf16>, vector<16x128xbf16>, vector<16x128xf32> -> vector<16x128xf32>
    %c0_61 = arith.constant 0 : index
    %c2048 = arith.constant 2048 : index
    %188 = vector.load %arg3[%c0_61, %c2048] : memref<128x2816xbf16, #tpu.memory_space<vmem>>, vector<128x128xbf16>
    %189 = arith.truncf %187 : vector<16x128xf32> to vector<16x128xbf16>
    %cst_62 = arith.constant dense<0.000000e+00> : vector<16x128xf32>
    %190 = tpu.matmul %189, %188, %cst_62 {dimension_numbers = #tpu.dot_dimension_numbers<[1], [0], [0], [1], [0, 0, 1, 1], [], []>} : vector<16x128xbf16>, vector<128x128xbf16>, vector<16x128xf32> -> vector<16x128xf32>
    %191 = vector.extract_strided_slice %167 {offsets = [0, 384], sizes = [16, 128], strides = [1, 1]} : vector<16x768xf32> to vector<16x128xf32>
    %192 = vector.extract_strided_slice %167 {offsets = [0, 512], sizes = [16, 128], strides = [1, 1]} : vector<16x768xf32> to vector<16x128xf32>
    %193 = vector.extract_strided_slice %167 {offsets = [0, 640], sizes = [16, 128], strides = [1, 1]} : vector<16x768xf32> to vector<16x128xf32>
    %194 = arith.truncf %191 : vector<16x128xf32> to vector<16x128xbf16>
    %195 = arith.truncf %192 : vector<16x128xf32> to vector<16x128xbf16>
    %cst_63 = arith.constant dense<0.000000e+00> : vector<16x16xf32>
    %196 = tpu.matmul %194, %195, %cst_63 {dimension_numbers = #tpu.dot_dimension_numbers<[1], [1], [0], [0], [0, 0, 1, 0], [], []>} : vector<16x128xbf16>, vector<16x128xbf16>, vector<16x16xf32> -> vector<16x16xf32>
    %197 = arith.addf %196, %5 : vector<16x16xf32>
    %cst_64 = arith.constant dense<0xFF800000> : vector<16xf32>
    %198 = vector.multi_reduction <maximumf>, %197, %cst_64 [1] : vector<16x16xf32> to vector<16xf32>
    %199 = vector.shape_cast %198 : vector<16xf32> to vector<16x1xf32>
    %200 = vector.broadcast %199 : vector<16x1xf32> to vector<16x16xf32>
    %201 = arith.subf %197, %200 : vector<16x16xf32>
    %202 = math.exp %201 : vector<16x16xf32>
    %cst_65 = arith.constant dense<0.000000e+00> : vector<16xf32>
    %203 = vector.multi_reduction <add>, %202, %cst_65 [1] : vector<16x16xf32> to vector<16xf32>
    %204 = vector.shape_cast %203 : vector<16xf32> to vector<16x1xf32>
    %205 = tpu.reciprocal %204 {approx = true} : vector<16x1xf32> -> vector<16x1xf32>
    %206 = vector.broadcast %205 : vector<16x1xf32> to vector<16x16xf32>
    %207 = arith.mulf %202, %206 : vector<16x16xf32>
    %208 = arith.truncf %207 : vector<16x16xf32> to vector<16x16xbf16>
    %209 = arith.truncf %193 : vector<16x128xf32> to vector<16x128xbf16>
    %cst_66 = arith.constant dense<0.000000e+00> : vector<16x128xf32>
    %210 = tpu.matmul %208, %209, %cst_66 {dimension_numbers = #tpu.dot_dimension_numbers<[1], [0], [0], [1], [0, 0, 1, 1], [], []>} : vector<16x16xbf16>, vector<16x128xbf16>, vector<16x128xf32> -> vector<16x128xf32>
    %c0_67 = arith.constant 0 : index
    %c2176 = arith.constant 2176 : index
    %211 = vector.load %arg3[%c0_67, %c2176] : memref<128x2816xbf16, #tpu.memory_space<vmem>>, vector<128x128xbf16>
    %212 = arith.truncf %210 : vector<16x128xf32> to vector<16x128xbf16>
    %cst_68 = arith.constant dense<0.000000e+00> : vector<16x128xf32>
    %213 = tpu.matmul %212, %211, %cst_68 {dimension_numbers = #tpu.dot_dimension_numbers<[1], [0], [0], [1], [0, 0, 1, 1], [], []>} : vector<16x128xbf16>, vector<128x128xbf16>, vector<16x128xf32> -> vector<16x128xf32>
    %214 = arith.addf %190, %213 : vector<16x128xf32>
    %c0_69 = arith.constant 0 : index
    %c2688 = arith.constant 2688 : index
    %215 = vector.load %arg4[%c0_69, %c2688] : memref<1x3840xf32, #tpu.memory_space<vmem>>, vector<1x128xf32>
    %216 = vector.broadcast %215 : vector<1x128xf32> to vector<16x128xf32>
    %217 = arith.addf %214, %216 : vector<16x128xf32>
    %218 = arith.addf %217, %161 : vector<16x128xf32>
    %c0_70 = arith.constant 0 : index
    %c2816 = arith.constant 2816 : index
    %219 = vector.load %arg4[%c0_70, %c2816] : memref<1x3840xf32, #tpu.memory_space<vmem>>, vector<1x128xf32>
    %c0_71 = arith.constant 0 : index
    %c2944 = arith.constant 2944 : index
    %220 = vector.load %arg4[%c0_71, %c2944] : memref<1x3840xf32, #tpu.memory_space<vmem>>, vector<1x128xf32>
    %cst_72 = arith.constant dense<0.000000e+00> : vector<16xf32>
    %221 = vector.multi_reduction <add>, %218, %cst_72 [1] : vector<16x128xf32> to vector<16xf32>
    %222 = vector.shape_cast %221 : vector<16xf32> to vector<16x1xf32>
    %cst_73 = arith.constant 3.125000e-02 : f32
    %223 = vector.broadcast %cst_73 : f32 to vector<16x1xf32>
    %224 = arith.mulf %222, %223 : vector<16x1xf32>
    %225 = vector.broadcast %224 : vector<16x1xf32> to vector<16x128xf32>
    %226 = arith.subf %218, %225 : vector<16x128xf32>
    %227 = vector.broadcast %4 : vector<1x128xf32> to vector<16x128xf32>
    %228 = arith.mulf %226, %227 : vector<16x128xf32>
    %229 = arith.mulf %228, %228 : vector<16x128xf32>
    %cst_74 = arith.constant dense<0.000000e+00> : vector<16xf32>
    %230 = vector.multi_reduction <add>, %229, %cst_74 [1] : vector<16x128xf32> to vector<16xf32>
    %231 = vector.shape_cast %230 : vector<16xf32> to vector<16x1xf32>
    %cst_75 = arith.constant 3.125000e-02 : f32
    %232 = vector.broadcast %cst_75 : f32 to vector<16x1xf32>
    %233 = arith.mulf %231, %232 : vector<16x1xf32>
    %cst_76 = arith.constant 9.99999996E-13 : f32
    %234 = vector.broadcast %cst_76 : f32 to vector<16x1xf32>
    %235 = arith.addf %233, %234 : vector<16x1xf32>
    %236 = math.rsqrt %235 : vector<16x1xf32>
    %237 = vector.broadcast %236 : vector<16x1xf32> to vector<16x128xf32>
    %238 = arith.mulf %228, %237 : vector<16x128xf32>
    %239 = vector.broadcast %219 : vector<1x128xf32> to vector<16x128xf32>
    %240 = arith.mulf %238, %239 : vector<16x128xf32>
    %241 = vector.broadcast %220 : vector<1x128xf32> to vector<16x128xf32>
    %242 = arith.addf %240, %241 : vector<16x128xf32>
    %c0_77 = arith.constant 0 : index
    %c2304 = arith.constant 2304 : index
    %243 = vector.load %arg3[%c0_77, %c2304] : memref<128x2816xbf16, #tpu.memory_space<vmem>>, vector<128x128xbf16>
    %244 = arith.truncf %242 : vector<16x128xf32> to vector<16x128xbf16>
    %cst_78 = arith.constant dense<0.000000e+00> : vector<16x128xf32>
    %245 = tpu.matmul %244, %243, %cst_78 {dimension_numbers = #tpu.dot_dimension_numbers<[1], [0], [0], [1], [0, 0, 1, 1], [], []>} : vector<16x128xbf16>, vector<128x128xbf16>, vector<16x128xf32> -> vector<16x128xf32>
    %c0_79 = arith.constant 0 : index
    %c3072 = arith.constant 3072 : index
    %246 = vector.load %arg4[%c0_79, %c3072] : memref<1x3840xf32, #tpu.memory_space<vmem>>, vector<1x128xf32>
    %247 = vector.broadcast %246 : vector<1x128xf32> to vector<16x128xf32>
    %248 = arith.addf %245, %247 : vector<16x128xf32>
    %cst_80 = arith.constant 5.000000e-01 : f32
    %249 = vector.broadcast %cst_80 : f32 to vector<16x128xf32>
    %250 = arith.mulf %249, %248 : vector<16x128xf32>
    %cst_81 = arith.constant 4.471500e-02 : f32
    %251 = vector.broadcast %cst_81 : f32 to vector<16x128xf32>
    %252 = arith.mulf %251, %248 : vector<16x128xf32>
    %253 = arith.mulf %252, %248 : vector<16x128xf32>
    %254 = arith.mulf %253, %248 : vector<16x128xf32>
    %255 = arith.addf %248, %254 : vector<16x128xf32>
    %cst_82 = arith.constant 0.797884583 : f32
    %256 = vector.broadcast %cst_82 : f32 to vector<16x128xf32>
    %257 = arith.mulf %256, %255 : vector<16x128xf32>
    %258 = math.tanh %257 : vector<16x128xf32>
    %cst_83 = arith.constant 1.000000e+00 : f32
    %259 = vector.broadcast %cst_83 : f32 to vector<16x128xf32>
    %260 = arith.addf %259, %258 : vector<16x128xf32>
    %261 = arith.mulf %250, %260 : vector<16x128xf32>
    %c0_84 = arith.constant 0 : index
    %c2432 = arith.constant 2432 : index
    %262 = vector.load %arg3[%c0_84, %c2432] : memref<128x2816xbf16, #tpu.memory_space<vmem>>, vector<128x128xbf16>
    %263 = arith.truncf %261 : vector<16x128xf32> to vector<16x128xbf16>
    %cst_85 = arith.constant dense<0.000000e+00> : vector<16x128xf32>
    %264 = tpu.matmul %263, %262, %cst_85 {dimension_numbers = #tpu.dot_dimension_numbers<[1], [0], [0], [1], [0, 0, 1, 1], [], []>} : vector<16x128xbf16>, vector<128x128xbf16>, vector<16x128xf32> -> vector<16x128xf32>
    %c0_86 = arith.constant 0 : index
    %c3200 = arith.constant 3200 : index
    %265 = vector.load %arg4[%c0_86, %c3200] : memref<1x3840xf32, #tpu.memory_space<vmem>>, vector<1x128xf32>
    %266 = vector.broadcast %265 : vector<1x128xf32> to vector<16x128xf32>
    %267 = arith.addf %264, %266 : vector<16x128xf32>
    %268 = arith.addf %267, %242 : vector<16x128xf32>
    %c0_87 = arith.constant 0 : index
    %c3328 = arith.constant 3328 : index
    %269 = vector.load %arg4[%c0_87, %c3328] : memref<1x3840xf32, #tpu.memory_space<vmem>>, vector<1x128xf32>
    %c0_88 = arith.constant 0 : index
    %c3456 = arith.constant 3456 : index
    %270 = vector.load %arg4[%c0_88, %c3456] : memref<1x3840xf32, #tpu.memory_space<vmem>>, vector<1x128xf32>
    %cst_89 = arith.constant dense<0.000000e+00> : vector<16xf32>
    %271 = vector.multi_reduction <add>, %268, %cst_89 [1] : vector<16x128xf32> to vector<16xf32>
    %272 = vector.shape_cast %271 : vector<16xf32> to vector<16x1xf32>
    %cst_90 = arith.constant 3.125000e-02 : f32
    %273 = vector.broadcast %cst_90 : f32 to vector<16x1xf32>
    %274 = arith.mulf %272, %273 : vector<16x1xf32>
    %275 = vector.broadcast %274 : vector<16x1xf32> to vector<16x128xf32>
    %276 = arith.subf %268, %275 : vector<16x128xf32>
    %277 = vector.broadcast %4 : vector<1x128xf32> to vector<16x128xf32>
    %278 = arith.mulf %276, %277 : vector<16x128xf32>
    %279 = arith.mulf %278, %278 : vector<16x128xf32>
    %cst_91 = arith.constant dense<0.000000e+00> : vector<16xf32>
    %280 = vector.multi_reduction <add>, %279, %cst_91 [1] : vector<16x128xf32> to vector<16xf32>
    %281 = vector.shape_cast %280 : vector<16xf32> to vector<16x1xf32>
    %cst_92 = arith.constant 3.125000e-02 : f32
    %282 = vector.broadcast %cst_92 : f32 to vector<16x1xf32>
    %283 = arith.mulf %281, %282 : vector<16x1xf32>
    %cst_93 = arith.constant 9.99999996E-13 : f32
    %284 = vector.broadcast %cst_93 : f32 to vector<16x1xf32>
    %285 = arith.addf %283, %284 : vector<16x1xf32>
    %286 = math.rsqrt %285 : vector<16x1xf32>
    %287 = vector.broadcast %286 : vector<16x1xf32> to vector<16x128xf32>
    %288 = arith.mulf %278, %287 : vector<16x128xf32>
    %289 = vector.broadcast %269 : vector<1x128xf32> to vector<16x128xf32>
    %290 = arith.mulf %288, %289 : vector<16x128xf32>
    %291 = vector.broadcast %270 : vector<1x128xf32> to vector<16x128xf32>
    %292 = arith.addf %290, %291 : vector<16x128xf32>
    %c0_94 = arith.constant 0 : index
    %c2560 = arith.constant 2560 : index
    %293 = vector.load %arg3[%c0_94, %c2560] : memref<128x2816xbf16, #tpu.memory_space<vmem>>, vector<128x128xbf16>
    %294 = arith.truncf %292 : vector<16x128xf32> to vector<16x128xbf16>
    %cst_95 = arith.constant dense<0.000000e+00> : vector<16x128xf32>
    %295 = tpu.matmul %294, %293, %cst_95 {dimension_numbers = #tpu.dot_dimension_numbers<[1], [0], [0], [1], [0, 0, 1, 1], [], []>} : vector<16x128xbf16>, vector<128x128xbf16>, vector<16x128xf32> -> vector<16x128xf32>
    %c0_96 = arith.constant 0 : index
    %c3584 = arith.constant 3584 : index
    %296 = vector.load %arg4[%c0_96, %c3584] : memref<1x3840xf32, #tpu.memory_space<vmem>>, vector<1x128xf32>
    %297 = vector.broadcast %296 : vector<1x128xf32> to vector<16x128xf32>
    %298 = arith.addf %295, %297 : vector<16x128xf32>
    %299 = math.tanh %298 : vector<16x128xf32>
    %c0_97 = arith.constant 0 : index
    %c2688_98 = arith.constant 2688 : index
    %300 = vector.load %arg3[%c0_97, %c2688_98] : memref<128x2816xbf16, #tpu.memory_space<vmem>>, vector<128x128xbf16>
    %301 = arith.truncf %299 : vector<16x128xf32> to vector<16x128xbf16>
    %cst_99 = arith.constant dense<0.000000e+00> : vector<16x128xf32>
    %302 = tpu.matmul %301, %300, %cst_99 {dimension_numbers = #tpu.dot_dimension_numbers<[1], [0], [0], [1], [0, 0, 1, 1], [], []>} : vector<16x128xbf16>, vector<128x128xbf16>, vector<16x128xf32> -> vector<16x128xf32>
    %c0_100 = arith.constant 0 : index
    %c3712 = arith.constant 3712 : index
    %303 = vector.load %arg4[%c0_100, %c3712] : memref<1x3840xf32, #tpu.memory_space<vmem>>, vector<1x128xf32>
    %304 = vector.broadcast %303 : vector<1x128xf32> to vector<16x128xf32>
    %305 = arith.addf %302, %304 : vector<16x128xf32>
    %c0_101 = arith.constant 0 : index
    %c0_102 = arith.constant 0 : index
    %306 = vector.load %arg5[%c0_101, %c0_102] : memref<16x128xf32, #tpu.memory_space<vmem>>, vector<16x128xf32>
    tpu.vector_store %arg5[%c0_101, %c0_102], %305 {strides = array<i32>} : memref<16x128xf32, #tpu.memory_space<vmem>>, vector<16x128xf32>,
    return
  }
  func.func @transform_0(%arg0: i32) -> (i32, i32) {
    %c0_i32 = arith.constant 0 : i32
    %c0_i32_0 = arith.constant 0 : i32
    %c0_i32_1 = arith.constant 0 : i32
    return %c0_i32, %c0_i32_0 : i32, i32
  }
  func.func @transform_1(%arg0: i32) -> (i32, i32) {
    %c0_i32 = arith.constant 0 : i32
    %c0_i32_0 = arith.constant 0 : i32
    %c0_i32_1 = arith.constant 0 : i32
    return %c0_i32, %c0_i32_0 : i32, i32
  }
  func.func @transform_2(%arg0: i32) -> (i32, i32) {
    %c0_i32 = arith.constant 0 : i32
    %c0_i32_0 = arith.constant 0 : i32
    %c0_i32_1 = arith.constant 0 : i32
    return %c0_i32, %c0_i32_0 : i32, i32
  }
  func.func @transform_3(%arg0: i32) -> (i32, i32) {
    %c0_i32 = arith.constant 0 : i32
    %c0_i32_0 = arith.constant 0 : i32
    %c0_i32_1 = arith.constant 0 : i32
    return %c0_i32, %c0_i32_0 : i32, i32
  }
  func.func @transform_4(%arg0: i32) -> (i32, i32) {
    %c0_i32 = arith.constant 0 : i32
    %c0_i32_0 = arith.constant 0 : i32
    %c0_i32_1 = arith.constant 0 : i32
    return %c0_i32, %c0_i32_0 : i32, i32
  }
}

</mosaic_0001>

<bundles_post_ra>
// kernel: surrogate_forward.1
= control target key start
LH: loop header
LB: loop body
LE: loop exit
PB: predicated region body
PF: predicated region fallthrough
CT: control target
= control target key end

     0   :  { %9 = vsyncpa [#allocation3], 0  ;;  %s3640_s15 = smov [#allocation2]   ;;  %s4053_s0 = inlined_call_operand.vmem [shape: f32[16,128], index: 0, kind: input, shape index: {}]   ;;  %s4054_s1 = inlined_call_operand.vmem [shape: f32[16,16], index: 1, kind: input, shape index: {}]   ;;  %s4055_s2 = inlined_call_operand.hbm [shape: bf16[128,2816], index: 2, kind: input, shape index: {}]   ;;  %s4056_s3 = inlined_call_operand.vmem [shape: f32[1,3840], index: 3, kind: input, shape index: {}]   ;;  %s4057_s4 = inlined_call_operand.vmem [shape: f32[16,128], index: 4, kind: output, shape index: {}]  }
   0x1   :  { %s19_s16 = sshll.u32 %s3640_s15, 4  ;;  %s20_s16 = int_to_ptr.vmem [resolvable:$true] %s19_s16 }
   0x2   :  { %s3626_s17 = scalar_lea.vmem %s20_s16, 22528  ;;  %p3631_p1 = scmp.lt.s32.totalorder %s20_s16, %s20_s16 }
   0x3   :  { %p3627_p0 = scmp.ne.s32.totalorder %s20_s16, %s3626_s17  ;;  %p3632_p2 = scmp.lt.s32.totalorder %s3626_s17, %s3626_s17 }
   0x5   :  { %p3633_p3 = por %p3632_p2, %p3631_p1 }
   0x7   :  { %p3634_p4 = pnand %p3633_p3, %p3627_p0 }
   0x9   :  { %3637 = shalt.err (!%p3634_p4)
}
   0xa   :  { %s3641_s18 = smov 1408   ;;  %s3642_s19 = smov 88  }
   0xb   :  { %25 = dma.hbm_to_vmem [thread:$0]  %s4055_s2, 22528, %s20_s16, [#allocation3], %s3641_s18, %s3641_s18, %s3642_s19  }
   0xc   :  { %3638 = dma.done.wait [#allocation3], 22528  }
   0xd   :  { %3639 = vsyncadd [#allocation3], 4294944768  ;;  %v39_v0 = vld [vmem:[%s4053_s0] sm:$0xff]  ;;  %v40_v1 = vld [vmem:[%s4053_s0 + $0x8] sm:$0xff]  ;;  %v32_v6 = vlaneseq  ;;  %v3643_v10 = vmov 0.0   ;;  %v3644_v42 = vmov 0  }
   0xe   :  { %43 = vadd.xlane.f32.xlu0 %v39_v0  ;;  %v3328_v2 = vld [vmem:[#allocation2 + $0x4d4] ss:$88 sps:$4 sm:$0xff]   ;;  %v3330_v3 = vld [vmem:[#allocation2 + $0x4d0] ss:$88 sps:$4 sm:$0xff]   ;;  %v3334_v20 = vld [vmem:[#allocation2 + $0x424] ss:$88 sps:$4 sm:$0xff]   ;;  %436 = vmatprep.mubr.bf16.mxu0 %v3644_v42 }
   0xf   :  { %v3331_v4 = vld [vmem:[#allocation2 + $0x4dc] ss:$88 sps:$4 sm:$0xff]   ;;  %v3333_v5 = vld [vmem:[#allocation2 + $0x4d8] ss:$88 sps:$4 sm:$0xff]   ;;  %404 = vmatprep.subr.bf16.mxu0 %v3328_v2  ;;  %v33_v7 = vand.u32 127, %v32_v6  ;;  %479 = vmatprep.mubr.bf16.mxu1 %v3644_v42  ;;  %vm3645_vm1 = vmmov 0  }
  0x10   :  { %447 = vmatprep.subr.bf16.mxu1 %v3331_v4  ;;  %405 = vmatpush1.bf16.msra.mxu0 %v3330_v3  ;;  %v3336_v21 = vld [vmem:[#allocation2 + $0x420] ss:$88 sps:$4 sm:$0xff]   ;;  %v3337_v22 = vld [vmem:[#allocation2 + $0x42c] ss:$88 sps:$4 sm:$0xff]   ;;  %v3342_v25 = vld [vmem:[#allocation2 + $0x370] ss:$88 sps:$4 sm:$0xff]  }
  0x11   :  { %448 = vmatpush1.bf16.msra.mxu1 %v3333_v5  ;;  %vm34_vm0 = vcmp.lt.s32.totalorder %v33_v7, 32  ;;  %406 = vmatprep.subr.bf16.mxu0 %v3334_v20  ;;  %v3339_v23 = vld [vmem:[#allocation2 + $0x428] ss:$88 sps:$4 sm:$0xff]   ;;  %v3340_v24 = vld [vmem:[#allocation2 + $0x374] ss:$88 sps:$4 sm:$0xff]   ;;  %vm576_vm2 = vcmask 130048  }
  0x12   :  { %45 = vadd.xlane.f32.xlu0 %v40_v1  ;;  %v3682_v11 = vsel %vm34_vm0, 1.0, %v3643_v10  ;;  %449 = vmatprep.subr.bf16.mxu1 %v3337_v22  ;;  %v3343_v26 = vld [vmem:[#allocation2 + $0x37c] ss:$88 sps:$4 sm:$0xff]   ;;  %v3345_v27 = vld [vmem:[#allocation2 + $0x378] ss:$88 sps:$4 sm:$0xff]  }
  0x13   :  { %v3346_v28 = vld [vmem:[#allocation2 + $0x2c4] ss:$88 sps:$4 sm:$0xff]   ;;  %v3348_v29 = vld [vmem:[#allocation2 + $0x2c0] ss:$88 sps:$4 sm:$0xff]   ;;  %v3352_v32 = vld [vmem:[#allocation2 + $0x214] ss:$88 sps:$4 sm:$0xff]  }
  0x14   :  { %407 = vmatpush1.bf16.msra.mxu0 %v3336_v21  ;;  %v3349_v30 = vld [vmem:[#allocation2 + $0x2cc] ss:$88 sps:$4 sm:$0xff]   ;;  %v3351_v31 = vld [vmem:[#allocation2 + $0x2c8] ss:$88 sps:$4 sm:$0xff]   ;;  %v3355_v33 = vld [vmem:[#allocation2 + $0x21c] ss:$88 sps:$4 sm:$0xff]  }
  0x15   :  { %450 = vmatpush1.bf16.msra.mxu1 %v3339_v23  ;;  %408 = vmatprep.subr.bf16.mxu0 %v3340_v24  ;;  %v3354_v34 = vld [vmem:[#allocation2 + $0x210] ss:$88 sps:$4 sm:$0xff]   ;;  %v3358_v36 = vld [vmem:[#allocation2 + $0x164] ss:$88 sps:$4 sm:$0xff]   ;;  %v3360_v38 = vld [vmem:[#allocation2 + $0x160] ss:$88 sps:$4 sm:$0xff]  }
  0x16   :  { %451 = vmatprep.subr.bf16.mxu1 %v3343_v26  ;;  %v3357_v35 = vld [vmem:[#allocation2 + $0x218] ss:$88 sps:$4 sm:$0xff]   ;;  %v3361_v37 = vld [vmem:[#allocation2 + $0x16c] ss:$88 sps:$4 sm:$0xff]   ;;  %v3363_v39 = vld [vmem:[#allocation2 + $0x168] ss:$88 sps:$4 sm:$0xff]  }
  0x17   :  { %v3364_v40 = vld [vmem:[#allocation2 + $0xb4] ss:$88 sps:$4 sm:$0xff]   ;;  %v3366_v43 = vld [vmem:[#allocation2 + $0xb0] ss:$88 sps:$4 sm:$0xff]   ;;  %v3370_v45 = vld [vmem:[#allocation2 + $0x4] ss:$88 sps:$4 sm:$0xff]  }
  0x18   :  { %409 = vmatpush1.bf16.msra.mxu0 %v3342_v25  ;;  %v3367_v41 = vld [vmem:[#allocation2 + $0xbc] ss:$88 sps:$4 sm:$0xff]   ;;  %v3369_v44 = vld [vmem:[#allocation2 + $0xb8] ss:$88 sps:$4 sm:$0xff]   ;;  %v3373_v46 = vld [vmem:[#allocation2 + $0xc] ss:$88 sps:$4 sm:$0xff]  }
  0x19   :  { %452 = vmatpush1.bf16.msra.mxu1 %v3345_v27  ;;  %410 = vmatprep.subr.bf16.mxu0 %v3346_v28  ;;  %v3372_v47 = vld [vmem:[#allocation2] ss:$88 sps:$4 sm:$0xff]   ;;  %v3378_v49 = vld [vmem:[#allocation2 + $0x4e4] ss:$88 sps:$4 sm:$0xff]   ;;  %v3381_v4 = vld [vmem:[#allocation2 + $0x434] ss:$88 sps:$4 sm:$0xff]  }
  0x1a   :  { %453 = vmatprep.subr.bf16.mxu1 %v3349_v30  ;;  %v3375_v48 = vld [vmem:[#allocation2 + $0x8] ss:$88 sps:$4 sm:$0xff]   ;;  %v3384_v7 = vld [vmem:[#allocation2 + $0x384] ss:$88 sps:$4 sm:$0xff]   ;;  %v3718_v21 = vshrl.u32 %v32_v6, 7 }
  0x1b   :  { %v2770_v58 = vld [vmem:[%s4056_s3] ss:$0 sm:$0xff]  ;;  %v2771_v62 = vld [vmem:[%s4056_s3 + $0x1] ss:$0 sm:$0xff]  ;;  %v3379_v5 = vld [vmem:[#allocation2 + $0x430] ss:$88 sps:$4 sm:$0xff]  }
  0x1c   :  { %411 = vmatpush1.bf16.msra.mxu0 %v3348_v29  ;;  %v3376_v2 = vld [vmem:[#allocation2 + $0x4e0] ss:$88 sps:$4 sm:$0xff]   ;;  %v3397_v20 = vld [vmem:[#allocation2 + $0x10] ss:$88 sps:$4 sm:$0xff]   ;;  %v140_v22 = vsub.s32 1, %v3718_v21  ;;  %v136_v29 = vsub.s32 0, %v3718_v21 }
  0x1d   :  { %454 = vmatpush1.bf16.msra.mxu1 %v3351_v31  ;;  %412 = vmatprep.subr.bf16.mxu0 %v3352_v32  ;;  %v3724_v24 = vld [vmem:[%s4056_s3 + $0x2] sm:$0x3f]  ;;  %v144_v31 = vsub.s32 2, %v3718_v21 }
  0x1e   :  { %455 = vmatprep.subr.bf16.mxu1 %v3355_v33  ;;  %v141_v27 = vrot.slane %v3724_v24, %v140_v22 }
  0x20   :  { %413 = vmatpush1.bf16.msra.mxu0 %v3354_v34 }
  0x21   :  { %456 = vmatpush1.bf16.msra.mxu1 %v3357_v35  ;;  %414 = vmatprep.subr.bf16.mxu0 %v3358_v36  ;;  %v137_v35 = vrot.slane %v3724_v24, %v136_v29 }
  0x22   :  { %457 = vmatprep.subr.bf16.mxu1 %v3361_v37  ;;  %v145_v37 = vrot.slane %v3724_v24, %v144_v31 }
  0x24   :  { %415 = vmatpush1.bf16.msra.mxu0 %v3360_v38 }
  0x25   :  { %458 = vmatpush1.bf16.msra.mxu1 %v3363_v39  ;;  %416 = vmatprep.subr.bf16.mxu0 %v3364_v40 }
  0x26   :  { %459 = vmatprep.subr.bf16.mxu1 %v3367_v41 }
  0x28   :  { %417 = vmatpush1.bf16.msra.mxu0 %v3366_v43 }
  0x29   :  { %460 = vmatpush1.bf16.msra.mxu1 %v3369_v44  ;;  %418 = vmatprep.subr.bf16.mxu0 %v3370_v45 }
  0x2a   :  { %461 = vmatprep.subr.bf16.mxu1 %v3373_v46  ;;  %v3746_v46 = vld [vmem:[%s4054_s1] sm:$0xff] }
  0x2c   :  { %419 = vmatpush1.bf16.msra.mxu0 %v3372_v47 }
  0x2d   :  { %462 = vmatpush1.bf16.msra.mxu1 %v3375_v48  ;;  %490 = vmatprep.subr.bf16.mxu0 %v3378_v49 }
  0x2e   :  { %3074 = vmatprep.subr.bf16.mxu1 %v3643_v10 }
  0x97   :  { %v44_v8 = vpop.xlane.xlu0 %43 }
  0x98   :  { %v47_v9 = vmul.f32 0.03125, %v44_v8  ;;  %v3382_v8 = vld [vmem:[#allocation2 + $0x380] ss:$88 sps:$4 sm:$0xff]  }
  0x9a   :  { %v49_v12 = vsub.f32 %v39_v0, %v47_v9  ;;  %v3387_v9 = vld [vmem:[#allocation2 + $0x2d4] ss:$88 sps:$4 sm:$0xff]  }
  0x9b   :  { %v46_v13 = vpop.xlane.xlu0 %45 }
  0x9c   :  { %v48_v14 = vmul.f32 0.03125, %v46_v13  ;;  %v3685_v15 = vmul.f32 %v3682_v11, %v49_v12  ;;  %v3385_v12 = vld [vmem:[#allocation2 + $0x2d0] ss:$88 sps:$4 sm:$0xff]   ;;  %v3390_v13 = vld [vmem:[#allocation2 + $0x224] ss:$88 sps:$4 sm:$0xff]  }
  0x9e   :  { %v50_v16 = vsub.f32 %v40_v1, %v48_v14  ;;  %v53_v17 = vmul.f32 %v3685_v15, %v3685_v15  ;;  %v3388_v14 = vld [vmem:[#allocation2 + $0x220] ss:$88 sps:$4 sm:$0xff]  }
  0xa0   :  { %55 = vadd.xlane.f32.xlu1 %v53_v17  ;;  %v3690_v18 = vmul.f32 %v3682_v11, %v50_v16  ;;  %v3391_v16 = vld [vmem:[#allocation2 + $0x170] ss:$88 sps:$4 sm:$0xff]   ;;  %v3396_v17 = vld [vmem:[#allocation2 + $0xc4] ss:$88 sps:$4 sm:$0xff]  }
  0xa2   :  { %v54_v19 = vmul.f32 %v3690_v18, %v3690_v18 }
  0xa4   :  { %57 = vadd.xlane.f32.xlu1 %v54_v19  ;;  %v3399_v19 = vld [vmem:[#allocation2 + $0x14] ss:$88 sps:$4 sm:$0xff]  }
 0x129   :  { %v56_v50 = vpop.xlane.xlu1 %55 }
 0x12a   :  { %v59_v51 = vmul.f32 0.03125, %v56_v50  ;;  %v3752_v50 = vld [vmem:[%s4054_s1 + $0x8] sm:$0xff] }
 0x12c   :  { %v61_v52 = vadd.f32 1e-12, %v59_v51 }
 0x12d   :  { %v58_v53 = vpop.xlane.xlu1 %57 }
 0x12e   :  { %3552 = vrsqrt.f32 %v61_v52  ;;  %v60_v54 = vmul.f32 0.03125, %v58_v53 }
 0x130   :  { %v62_v55 = vadd.f32 1e-12, %v60_v54 }
 0x132   :  { %3554 = vrsqrt.f32 %v62_v55 }
 0x13b   :  { %v3553_v56 = vpop.eup %3552 }
 0x13c   :  { %v65_v57 = vmul.f32 %v3553_v56, %v3685_v15  ;;  %v3393_v15 = vld [vmem:[#allocation2 + $0x174] ss:$88 sps:$4 sm:$0xff]  }
 0x13e   :  { %v73_v61 = vmul.f32 %v2770_v58, %v65_v57 }
 0x13f   :  { %v3555_v59 = vpop.eup %3554 }
 0x140   :  { %v66_v60 = vmul.f32 %v3555_v59, %v3690_v18  ;;  %v3705_v0 = vadd.f32 %v2771_v62, %v73_v61  ;;  %v3394_v18 = vld [vmem:[#allocation2 + $0xc0] ss:$88 sps:$4 sm:$0xff]  }
 0x142   :  { %v74_v63 = vmul.f32 %v2770_v58, %v66_v60 }
 0x144   :  { %v3707_v1 = vadd.f32 %v2771_v62, %v74_v63 }
 0x146   :  { %v131_v3 = vpack.c.bf16 %v3707_v1, %v3705_v0 }
 0x148   :  { %437 = vmatmul.mubr.bf16.vlgmr.msra.gmra.mxu0 %v131_v3  ;;  %480 = vmatmul.mubr.bf16.vlgmr.msra.gmra.mxu1 %v131_v3 }
 0x149   :  { %491 = vmatpush1.bf16.msra.mxu0 %v3376_v2  ;;  %522 = vmatprep.mubr.bf16.mxu0 %v3644_v42 }
 0x14a   :  { %492 = vmatprep.subr.bf16.mxu0 %v3381_v4  ;;  %3076 = vmatprep.mubr.msk.bf16.mxu1 %vm3645_vm1, %v3643_v10 }
 0x14d   :  { %493 = vmatpush1.bf16.msra.mxu0 %v3379_v5 }
 0x14e   :  { %494 = vmatprep.subr.bf16.mxu0 %v3384_v7 }
 0x151   :  { %495 = vmatpush1.bf16.msra.mxu0 %v3382_v8 }
 0x152   :  { %496 = vmatprep.subr.bf16.mxu0 %v3387_v9  ;;  %v152_v9 = vsub.s32 4, %v3718_v21 }
 0x155   :  { %497 = vmatpush1.bf16.msra.mxu0 %v3385_v12 }
 0x156   :  { %498 = vmatprep.subr.bf16.mxu0 %v3390_v13 }
 0x159   :  { %499 = vmatpush1.bf16.msra.mxu0 %v3388_v14  ;;  %v153_v14 = vrot.slane %v3724_v24, %v152_v9 }
 0x15a   :  { %500 = vmatprep.subr.bf16.mxu0 %v3393_v15 }
 0x15d   :  { %501 = vmatpush1.bf16.msra.mxu0 %v3391_v16 }
 0x15e   :  { %502 = vmatprep.subr.bf16.mxu0 %v3396_v17  ;;  %v148_v17 = vsub.s32 3, %v3718_v21 }
 0x161   :  { %503 = vmatpush1.bf16.msra.mxu0 %v3394_v18 }
 0x162   :  { %504 = vmatprep.subr.bf16.mxu0 %v3399_v19 }
 0x165   :  { %505 = vmatpush1.bf16.msra.mxu0 %v3397_v20 }
 0x166   :  { %3098 = vmatprep.subr.bf16.mxu0 %v3643_v10 }
 0x168   :  { %523 = vmatmul.mubr.bf16.vlgmr.msra.gmra.mxu0 %v131_v3 }
 0x169   :  { %3114 = vmatprep.mubr.msk.bf16.mxu0 %vm3645_vm1, %v3643_v10 }
 0x208   :  { %v438_v23 = vpop.f32.mrf.mxu0  ;;  %v481_v25 = vpop.f32.mrf.mxu1 }
 0x209   :  { %v439_v40 = vadd.f32 %v438_v23, %v137_v35  ;;  %v482_v41 = vadd.f32 %v481_v25, %v145_v37  ;;  %v156_v23 = vsub.s32 5, %v3718_v21 }
 0x20a   :  { %v440_v26 = vpop.f32.mrf.mxu0  ;;  %v3730_v30 = vpop.f32.mrf.mxu1 }
 0x20b   :  { %v441_v32 = vadd.f32 %v440_v26, %v141_v27 }
 0x20c   :  { %v442_v28 = vpop.f32.mrf.mxu0  ;;  %v485_v36 = vpop.f32.mrf.mxu1 }
 0x20d   :  { %v443_v38 = vadd.f32 %v442_v28, %v137_v35  ;;  %v486_v39 = vadd.f32 %v485_v36, %v145_v37 }
 0x20e   :  { %v444_v6 = vpop.f32.mrf.mxu0  ;;  %v487_v45 = vpop.f32.mrf.mxu1 }
 0x20f   :  { %v445_v33 = vadd.f32 %v444_v6, %v141_v27  ;;  %v533_v43 = vpack.c.bf16 %v443_v38, %v439_v40  ;;  %v600_v44 = vpack.c.bf16 %v486_v39, %v482_v41  ;;  %v149_v27 = vrot.slane %v3724_v24, %v148_v17 }
 0x210   :  { %v157_v6 = vrot.slane %v3724_v24, %v156_v23 }
 0x211   :  { %v534_v34 = vpack.c.bf16 %v445_v33, %v441_v32  ;;  %v488_v32 = vadd.f32 %v487_v45, %v149_v27 }
 0x213   :  { %3075 = vmatpush3.bf16.xpose.msra.mxu1 %v534_v34  ;;  %v484_v34 = vadd.f32 %v3730_v30, %v149_v27  ;;  %v3405_v27 = vld [vmem:[#allocation2 + $0x178] ss:$88 sps:$4 sm:$0xff]  }
 0x214   :  { %3080 = vmatprep.subr.bf16.mxu1 %v3643_v10 }
 0x215   :  { %v662_v36 = vpack.c.bf16 %v488_v32, %v484_v34  ;;  %v3414_v32 = vld [vmem:[#allocation2 + $0xcc] ss:$88 sps:$4 sm:$0xff]  }
 0x21a   :  { %3077 = vmatmul.mubr.bf16.vlgmr.msra.gmra.mxu1 %v533_v43 }
 0x21b   :  { %3081 = vmatpush3.bf16.msra.mxu1 %v600_v44  ;;  %3082 = vmatprep.mubr.msk.bf16.mxu1 %vm3645_vm1, %v3643_v10 }
 0x21c   :  { %3086 = vmatprep.subr.bf16.mxu1 %v3643_v10 }
 0x228   :  { %v524_v7 = vpop.f32.mrf.mxu0 }
 0x229   :  { %v525_v20 = vadd.f32 %v524_v7, %v153_v14 }
 0x22a   :  { %v526_v8 = vpop.f32.mrf.mxu0 }
 0x22b   :  { %v527_v35 = vadd.f32 %v526_v8, %v157_v6 }
 0x22c   :  { %v528_v12 = vpop.f32.mrf.mxu0 }
 0x22d   :  { %v529_v16 = vadd.f32 %v528_v12, %v153_v14 }
 0x22e   :  { %v530_v28 = vpop.f32.mrf.mxu0 }
 0x22f   :  { %v663_v26 = vpack.c.bf16 %v529_v16, %v525_v20  ;;  %v531_v33 = vadd.f32 %v530_v28, %v157_v6  ;;  %v3400_v16 = vld [vmem:[#allocation2 + $0x4e8] ss:$88 sps:$4 sm:$0xff]   ;;  %v3407_v6 = vld [vmem:[#allocation2 + $0x18] ss:$88 sps:$4 sm:$0xff]  }
 0x230   :  { %v3402_v20 = vld [vmem:[#allocation2 + $0x388] ss:$88 sps:$4 sm:$0xff]  }
 0x231   :  { %v728_v37 = vpack.c.bf16 %v531_v33, %v527_v35  ;;  %v3406_v28 = vld [vmem:[#allocation2 + $0xc8] ss:$88 sps:$4 sm:$0xff]   ;;  %v3415_v33 = vld [vmem:[#allocation2 + $0x1c] ss:$88 sps:$4 sm:$0xff]  }
 0x2da   :  { %v569_v47 = vpop.f32.mrf.mxu1 }
 0x2db   :  { %v570_v48 = vadd.f32 %v569_v47, %v3746_v46 }
 0x2dc   :  { %v3078_v49 = vpop.f32.mrf.mxu1 }
 0x2dd   :  { %v577_v51 = vsel %vm576_vm2, %v570_v48, -inf }
 0x2de   :  { %v572_v52 = vpop.f32.mrf.mxu1  ;;  %578 = vmax.xlane.f32.xlu0 %v577_v51 }
 0x2df   :  { %v573_v53 = vadd.f32 %v572_v52, %v3752_v50 }
 0x2e0   :  { %v3079_v54 = vpop.f32.mrf.mxu1 }
 0x2e1   :  { %v580_v55 = vsel %vm576_vm2, %v573_v53, -inf }
 0x2e2   :  { %581 = vmax.xlane.f32.xlu1 %v580_v55 }
 0x367   :  { %v579_v56 = vpop.xlane.xlu0 %578 }
 0x368   :  { %v583_v57 = vsub.f32 %v570_v48, %v579_v56 }
 0x36a   :  { %v585_v58 = vmul.f32 1.442695, %v583_v57 }
 0x36b   :  { %v582_v59 = vpop.xlane.xlu1 %581 }
 0x36c   :  { %3556 = vpow2.f32 %v585_v58  ;;  %v584_v60 = vsub.f32 %v573_v53, %v582_v59 }
 0x36e   :  { %v587_v61 = vmul.f32 1.442695, %v584_v60 }
 0x370   :  { %3558 = vpow2.f32 %v587_v61 }
 0x379   :  { %v3557_v62 = vpop.eup %3556 }
 0x37a   :  { %v589_v63 = vsel %vm576_vm2, %v3557_v62, 0.0 }
 0x37b   :  { %590 = vadd.xlane.f32.xlu0 %v589_v63  ;;  %v3409_v63 = vld [vmem:[#allocation2 + $0x43c] ss:$88 sps:$4 sm:$0xff]  }
 0x37d   :  { %v3559_v2 = vpop.eup %3558 }
 0x37e   :  { %v592_v3 = vsel %vm576_vm2, %v3559_v2, 0.0 }
 0x37f   :  { %593 = vadd.xlane.f32.xlu1 %v592_v3  ;;  %v3411_v3 = vld [vmem:[#allocation2 + $0x2dc] ss:$88 sps:$4 sm:$0xff]  }
 0x404   :  { %v591_v4 = vpop.xlane.xlu0 %590 }
 0x405   :  { %3560 = vrcp.f32 %v591_v4  ;;  %v3412_v4 = vld [vmem:[#allocation2 + $0x22c] ss:$88 sps:$4 sm:$0xff]  }
 0x408   :  { %v594_v5 = vpop.xlane.xlu1 %593 }
 0x409   :  { %3562 = vrcp.f32 %v594_v5  ;;  %v3413_v5 = vld [vmem:[#allocation2 + $0x17c] ss:$88 sps:$4 sm:$0xff]  }
 0x412   :  { %v3561_v13 = vpop.eup %3560 }
 0x413   :  { %v597_v18 = vmul.f32 %v3561_v13, %v3557_v62  ;;  %v3408_v62 = vld [vmem:[#allocation2 + $0x4ec] ss:$88 sps:$4 sm:$0xff]  }
 0x414   :  { %3099 = vmatpush3.bf16.msra.mxu0 %v3408_v62 }
 0x415   :  { %3100 = vmatprep.subr.bf16.mxu0 %v3643_v10 }
 0x416   :  { %v3563_v15 = vpop.eup %3562 }
 0x417   :  { %v598_v19 = vmul.f32 %v3563_v15, %v3559_v2  ;;  %v3410_v2 = vld [vmem:[#allocation2 + $0x38c] ss:$88 sps:$4 sm:$0xff]  }
 0x418   :  { %3101 = vmatpush3.bf16.msra.mxu0 %v3409_v63 }
 0x419   :  { %v599_v25 = vpack.c.bf16 %v598_v19, %v597_v18  ;;  %3102 = vmatprep.subr.bf16.mxu0 %v3643_v10  ;;  %v3401_v19 = vld [vmem:[#allocation2 + $0x438] ss:$88 sps:$4 sm:$0xff]  }
 0x41b   :  { %3083 = vmatmul.mubr.msk.bf16.vlgmr.msra.gmra.mxu1 %vm576_vm2, %v599_v25  ;;  %v3403_v25 = vld [vmem:[#allocation2 + $0x2d8] ss:$88 sps:$4 sm:$0xff]  }
 0x41c   :  { %3087 = vmatpush3.bf16.xpose.msra.mxu1 %v663_v26  ;;  %3088 = vmatprep.mubr.msk.bf16.mxu1 %vm3645_vm1, %v3643_v10  ;;  %v3404_v26 = vld [vmem:[#allocation2 + $0x228] ss:$88 sps:$4 sm:$0xff]  }
 0x41d   :  { %3092 = vmatprep.subr.bf16.mxu1 %v3643_v10  ;;  %3103 = vmatpush3.bf16.msra.mxu0 %v3410_v2 }
 0x41e   :  { %3104 = vmatprep.subr.bf16.mxu0 %v3643_v10 }
 0x421   :  { %3105 = vmatpush3.bf16.msra.mxu0 %v3411_v3  ;;  %v3418_v3 = vld [vmem:[#allocation2 + $0x390] ss:$88 sps:$4 sm:$0xff]  }
 0x422   :  { %3106 = vmatprep.subr.bf16.mxu0 %v3643_v10 }
 0x423   :  { %3089 = vmatmul.mubr.bf16.vlgmr.msra.gmra.mxu1 %v662_v36 }
 0x424   :  { %3093 = vmatpush3.bf16.msra.mxu1 %v728_v37  ;;  %3094 = vmatprep.mubr.msk.bf16.mxu1 %vm3645_vm1, %v3643_v10 }
 0x425   :  { %3118 = vmatprep.subr.bf16.mxu1 %v3643_v10  ;;  %3107 = vmatpush3.bf16.msra.mxu0 %v3412_v4  ;;  %v3419_v4 = vld [vmem:[#allocation2 + $0x2e0] ss:$88 sps:$4 sm:$0xff]  }
 0x426   :  { %3108 = vmatprep.subr.bf16.mxu0 %v3643_v10 }
 0x429   :  { %3109 = vmatpush3.bf16.msra.mxu0 %v3413_v5  ;;  %v3420_v5 = vld [vmem:[#allocation2 + $0x230] ss:$88 sps:$4 sm:$0xff]  }
 0x42a   :  { %3110 = vmatprep.subr.bf16.mxu0 %v3643_v10 }
 0x42d   :  { %3111 = vmatpush3.bf16.msra.mxu0 %v3414_v32  ;;  %v2840_v32 = vld [vmem:[%s4056_s3 + $0xa] ss:$0 sm:$0xff] }
 0x42e   :  { %3112 = vmatprep.subr.bf16.mxu0 %v3643_v10 }
 0x431   :  { %3113 = vmatpush3.bf16.msra.mxu0 %v3415_v33 }
 0x432   :  { %3138 = vmatprep.subr.bf16.mxu0 %v3643_v10 }
 0x4db   :  { %v3779_v24 = vpop.f32.mrf.mxu1 }
 0x4dd   :  { %v3084_v38 = vpop.f32.mrf.mxu1 }
 0x4df   :  { %v3781_v39 = vpop.f32.mrf.mxu1 }
 0x4e0   :  { %v661_v40 = vpack.c.bf16 %v3781_v39, %v3779_v24 }
 0x4e1   :  { %v3085_v41 = vpop.f32.mrf.mxu1 }
 0x4e3   :  { %v698_v30 = vpop.f32.mrf.mxu1 }
 0x4e4   :  { %v699_v43 = vadd.f32 %v698_v30, %v3746_v46 }
 0x4e5   :  { %v3090_v44 = vpop.f32.mrf.mxu1 }
 0x4e6   :  { %v705_v45 = vsel %vm576_vm2, %v699_v43, -inf }
 0x4e7   :  { %706 = vmax.xlane.f32.xlu0 %v705_v45  ;;  %v701_v47 = vpop.f32.mrf.mxu1 }
 0x4e8   :  { %v702_v48 = vadd.f32 %v701_v47, %v3752_v50 }
 0x4e9   :  { %v3091_v49 = vpop.f32.mrf.mxu1 }
 0x4ea   :  { %v708_v51 = vsel %vm576_vm2, %v702_v48, -inf }
 0x4eb   :  { %709 = vmax.xlane.f32.xlu1 %v708_v51 }
 0x570   :  { %v707_v52 = vpop.xlane.xlu0 %706 }
 0x571   :  { %v711_v53 = vsub.f32 %v699_v43, %v707_v52  ;;  %v2838_v43 = vld [vmem:[%s4056_s3 + $0x8] ss:$0 sm:$0xff] }
 0x573   :  { %v713_v54 = vmul.f32 1.442695, %v711_v53 }
 0x574   :  { %v710_v55 = vpop.xlane.xlu1 %709 }
 0x575   :  { %3564 = vpow2.f32 %v713_v54  ;;  %v712_v56 = vsub.f32 %v702_v48, %v710_v55  ;;  %v3416_v55 = vld [vmem:[#allocation2 + $0x4f0] ss:$88 sps:$4 sm:$0xff]  }
 0x577   :  { %v715_v57 = vmul.f32 1.442695, %v712_v56 }
 0x579   :  { %3566 = vpow2.f32 %v715_v57 }
 0x582   :  { %v3565_v58 = vpop.eup %3564 }
 0x583   :  { %v717_v59 = vsel %vm576_vm2, %v3565_v58, 0.0 }
 0x584   :  { %718 = vadd.xlane.f32.xlu0 %v717_v59 }
 0x586   :  { %v3567_v60 = vpop.eup %3566 }
 0x587   :  { %v720_v61 = vsel %vm576_vm2, %v3567_v60, 0.0 }
 0x588   :  { %721 = vadd.xlane.f32.xlu1 %v720_v61 }
 0x60d   :  { %v719_v7 = vpop.xlane.xlu0 %718 }
 0x60e   :  { %3568 = vrcp.f32 %v719_v7  ;;  %v3421_v7 = vld [vmem:[#allocation2 + $0x180] ss:$88 sps:$4 sm:$0xff]  }
 0x611   :  { %v722_v8 = vpop.xlane.xlu1 %721 }
 0x612   :  { %3570 = vrcp.f32 %v722_v8  ;;  %v3422_v8 = vld [vmem:[#allocation2 + $0xd0] ss:$88 sps:$4 sm:$0xff]  }
 0x61b   :  { %v3569_v12 = vpop.eup %3568 }
 0x61c   :  { %v725_v14 = vmul.f32 %v3569_v12, %v3565_v58  ;;  %v3423_v12 = vld [vmem:[#allocation2 + $0x20] ss:$88 sps:$4 sm:$0xff]  }
 0x61f   :  { %v3571_v13 = vpop.eup %3570 }
 0x620   :  { %v726_v15 = vmul.f32 %v3571_v13, %v3567_v60 }
 0x622   :  { %v727_v18 = vpack.c.bf16 %v726_v15, %v725_v14 }
 0x624   :  { %3095 = vmatmul.mubr.msk.bf16.vlgmr.msra.gmra.mxu1 %vm576_vm2, %v727_v18 }
 0x625   :  { %3119 = vmatpush3.bf16.msra.mxu1 %v3400_v16  ;;  %3134 = vmatprep.mubr.msk.bf16.mxu1 %vm3645_vm1, %v3643_v10 }
 0x626   :  { %3120 = vmatprep.subr.bf16.mxu1 %v3643_v10 }
 0x629   :  { %3121 = vmatpush3.bf16.msra.mxu1 %v3401_v19 }
 0x62a   :  { %3122 = vmatprep.subr.bf16.mxu1 %v3643_v10 }
 0x62d   :  { %3123 = vmatpush3.bf16.msra.mxu1 %v3402_v20 }
 0x62e   :  { %3124 = vmatprep.subr.bf16.mxu1 %v3643_v10 }
 0x631   :  { %3125 = vmatpush3.bf16.msra.mxu1 %v3403_v25 }
 0x632   :  { %3126 = vmatprep.subr.bf16.mxu1 %v3643_v10 }
 0x635   :  { %3127 = vmatpush3.bf16.msra.mxu1 %v3404_v26  ;;  %v2839_v26 = vld [vmem:[%s4056_s3 + $0x9] ss:$0 sm:$0xff] }
 0x636   :  { %3128 = vmatprep.subr.bf16.mxu1 %v3643_v10 }
 0x639   :  { %3129 = vmatpush3.bf16.msra.mxu1 %v3405_v27 }
 0x63a   :  { %3130 = vmatprep.subr.bf16.mxu1 %v3643_v10 }
 0x63d   :  { %3131 = vmatpush3.bf16.msra.mxu1 %v3406_v28 }
 0x63e   :  { %3132 = vmatprep.subr.bf16.mxu1 %v3643_v10 }
 0x641   :  { %3133 = vmatpush3.bf16.msra.mxu1 %v3407_v6 }
 0x642   :  { %3158 = vmatprep.subr.bf16.mxu1 %v3643_v10 }
 0x644   :  { %3135 = vmatmul.mubr.bf16.vlgmr.msra.gmra.mxu1 %v661_v40 }
 0x645   :  { %3174 = vmatprep.mubr.msk.bf16.mxu1 %vm3645_vm1, %v3643_v10 }
 0x6e4   :  { %v766_v34 = vpop.f32.mrf.mxu1 }
 0x6e6   :  { %v3096_v35 = vpop.f32.mrf.mxu1 }
 0x6e8   :  { %v769_v36 = vpop.f32.mrf.mxu1 }
 0x6e9   :  { %v789_v37 = vpack.c.bf16 %v769_v36, %v766_v34 }
 0x6ea   :  { %v3097_v38 = vpop.f32.mrf.mxu1 }
 0x6eb   :  { %3115 = vmatmul.mubr.bf16.vlgmr.msra.gmra.mxu0 %v789_v37  ;;  %v3424_v37 = vld [vmem:[#allocation2 + $0x4f4] ss:$88 sps:$4 sm:$0xff]   ;;  %v3425_v38 = vld [vmem:[#allocation2 + $0x444] ss:$88 sps:$4 sm:$0xff]  }
 0x6ec   :  { %3154 = vmatprep.mubr.msk.bf16.mxu0 %vm3645_vm1, %v3643_v10  ;;  %3139 = vmatpush3.bf16.msra.mxu0 %v3416_v55 }
 0x6ed   :  { %3140 = vmatprep.subr.bf16.mxu0 %v3643_v10  ;;  %3159 = vmatpush3.bf16.msra.mxu1 %v3424_v37 }
 0x6ee   :  { %3160 = vmatprep.subr.bf16.mxu1 %v3643_v10 }
 0x6f1   :  { %3161 = vmatpush3.bf16.msra.mxu1 %v3425_v38 }
 0x6f2   :  { %3162 = vmatprep.subr.bf16.mxu1 %v3643_v10 }
 0x704   :  { %v961_v24 = vpop.f32.mrf.mxu1 }
 0x706   :  { %v3136_v39 = vpop.f32.mrf.mxu1 }
 0x707   :  { %v3427_v39 = vld [vmem:[#allocation2 + $0x2e4] ss:$88 sps:$4 sm:$0xff]  }
 0x708   :  { %v964_v40 = vpop.f32.mrf.mxu1 }
 0x70a   :  { %v3137_v41 = vpop.f32.mrf.mxu1 }
 0x70b   :  { %v3429_v41 = vld [vmem:[#allocation2 + $0x184] ss:$88 sps:$4 sm:$0xff]  }
 0x7ab   :  { %v872_v30 = vpop.f32.mrf.mxu0 }
 0x7ac   :  { %v962_v44 = vadd.f32 %v961_v24, %v872_v30  ;;  %v3426_v24 = vld [vmem:[#allocation2 + $0x394] ss:$88 sps:$4 sm:$0xff]  }
 0x7ad   :  { %v3116_v45 = vpop.f32.mrf.mxu0  ;;  %3163 = vmatpush3.bf16.msra.mxu1 %v3426_v24  ;;  %v3430_v30 = vld [vmem:[#allocation2 + $0xd4] ss:$88 sps:$4 sm:$0xff]  }
 0x7ae   :  { %v975_v47 = vadd.f32 %v2838_v43, %v962_v44  ;;  %3164 = vmatprep.subr.bf16.mxu1 %v3643_v10  ;;  %v2841_v44 = vld [vmem:[%s4056_s3 + $0xb] ss:$0 sm:$0xff] }
 0x7af   :  { %v875_v48 = vpop.f32.mrf.mxu0 }
 0x7b0   :  { %v965_v49 = vadd.f32 %v964_v40, %v875_v48  ;;  %v977_v51 = vadd.f32 %v975_v47, %v3705_v0  ;;  %v3428_v40 = vld [vmem:[#allocation2 + $0x234] ss:$88 sps:$4 sm:$0xff]  }
 0x7b1   :  { %v3117_v52 = vpop.f32.mrf.mxu0  ;;  %3165 = vmatpush3.bf16.msra.mxu1 %v3427_v39 }
 0x7b2   :  { %v976_v53 = vadd.f32 %v2838_v43, %v965_v49  ;;  %981 = vadd.xlane.f32.xlu0 %v977_v51  ;;  %3166 = vmatprep.subr.bf16.mxu1 %v3643_v10  ;;  %v3431_v43 = vld [vmem:[#allocation2 + $0x24] ss:$88 sps:$4 sm:$0xff]  }
 0x7b4   :  { %v978_v54 = vadd.f32 %v976_v53, %v3707_v1  ;;  %v3417_v1 = vld [vmem:[#allocation2 + $0x440] ss:$88 sps:$4 sm:$0xff]  }
 0x7b5   :  { %3141 = vmatpush3.bf16.msra.mxu0 %v3417_v1  ;;  %3167 = vmatpush3.bf16.msra.mxu1 %v3428_v40 }
 0x7b6   :  { %983 = vadd.xlane.f32.xlu1 %v978_v54  ;;  %3142 = vmatprep.subr.bf16.mxu0 %v3643_v10 }
 0x7b7   :  { %3168 = vmatprep.subr.bf16.mxu1 %v3643_v10 }
 0x7b9   :  { %3143 = vmatpush3.bf16.msra.mxu0 %v3418_v3  ;;  %3169 = vmatpush3.bf16.msra.mxu1 %v3429_v41  ;;  %v3440_v41 = vld [vmem:[#allocation2 + $0x44c] ss:$88 sps:$4 sm:$0xff]  }
 0x7ba   :  { %3144 = vmatprep.subr.bf16.mxu0 %v3643_v10  ;;  %3170 = vmatprep.subr.bf16.mxu1 %v3643_v10 }
 0x7bd   :  { %3145 = vmatpush3.bf16.msra.mxu0 %v3419_v4  ;;  %3171 = vmatpush3.bf16.msra.mxu1 %v3430_v30  ;;  %v3438_v30 = vld [vmem:[#allocation2 + $0x448] ss:$88 sps:$4 sm:$0xff]  }
 0x7be   :  { %3146 = vmatprep.subr.bf16.mxu0 %v3643_v10  ;;  %3172 = vmatprep.subr.bf16.mxu1 %v3643_v10 }
 0x7c1   :  { %3147 = vmatpush3.bf16.msra.mxu0 %v3420_v5  ;;  %3173 = vmatpush3.bf16.msra.mxu1 %v3431_v43  ;;  %v3443_v43 = vld [vmem:[#allocation2 + $0x454] ss:$88 sps:$4 sm:$0xff]  }
 0x7c2   :  { %3148 = vmatprep.subr.bf16.mxu0 %v3643_v10 }
 0x7c5   :  { %3149 = vmatpush3.bf16.msra.mxu0 %v3421_v7 }
 0x7c6   :  { %3150 = vmatprep.subr.bf16.mxu0 %v3643_v10 }
 0x7c9   :  { %3151 = vmatpush3.bf16.msra.mxu0 %v3422_v8 }
 0x7ca   :  { %3152 = vmatprep.subr.bf16.mxu0 %v3643_v10 }
 0x7cd   :  { %3153 = vmatpush3.bf16.msra.mxu0 %v3423_v12  ;;  %v2850_v12 = vld [vmem:[%s4056_s3 + $0xc] ss:$0 sm:$0xff] }
 0x83b   :  { %v982_v56 = vpop.xlane.xlu0 %981 }
 0x83c   :  { %v985_v57 = vmul.f32 0.03125, %v982_v56 }
 0x83e   :  { %v987_v58 = vsub.f32 %v977_v51, %v985_v57 }
 0x83f   :  { %v984_v59 = vpop.xlane.xlu1 %983 }
 0x840   :  { %v986_v60 = vmul.f32 0.03125, %v984_v59  ;;  %v989_v61 = vmul.f32 %v3682_v11, %v987_v58 }
 0x842   :  { %v988_v62 = vsub.f32 %v978_v54, %v986_v60  ;;  %v991_v63 = vmul.f32 %v989_v61, %v989_v61 }
 0x844   :  { %993 = vadd.xlane.f32.xlu0 %v991_v63  ;;  %v990_v0 = vmul.f32 %v3682_v11, %v988_v62 }
 0x846   :  { %v992_v2 = vmul.f32 %v990_v0, %v990_v0 }
 0x848   :  { %995 = vadd.xlane.f32.xlu1 %v992_v2 }
 0x8cd   :  { %v994_v13 = vpop.xlane.xlu0 %993 }
 0x8ce   :  { %v997_v14 = vmul.f32 0.03125, %v994_v13 }
 0x8d0   :  { %v999_v15 = vadd.f32 1e-12, %v997_v14 }
 0x8d1   :  { %v996_v16 = vpop.xlane.xlu1 %995 }
 0x8d2   :  { %3572 = vrsqrt.f32 %v999_v15  ;;  %v998_v18 = vmul.f32 0.03125, %v996_v16 }
 0x8d4   :  { %v1000_v19 = vadd.f32 1e-12, %v998_v18 }
 0x8d6   :  { %3574 = vrsqrt.f32 %v1000_v19 }
 0x8df   :  { %v3573_v20 = vpop.eup %3572 }
 0x8e0   :  { %v1003_v25 = vmul.f32 %v3573_v20, %v989_v61 }
 0x8e2   :  { %v1011_v6 = vmul.f32 %v2839_v26, %v1003_v25 }
 0x8e3   :  { %v3575_v27 = vpop.eup %3574 }
 0x8e4   :  { %v1004_v28 = vmul.f32 %v3575_v27, %v990_v0  ;;  %v1019_v34 = vadd.f32 %v2840_v32, %v1011_v6  ;;  %v3434_v27 = vld [vmem:[#allocation2 + $0x4fc] ss:$88 sps:$4 sm:$0xff]  }
 0x8e5   :  { %v3437_v6 = vld [vmem:[#allocation2 + $0x504] ss:$88 sps:$4 sm:$0xff]   ;;  %1630 = vmatprep.subr.bf16.mxu0 %v3434_v27 }
 0x8e6   :  { %v1012_v33 = vmul.f32 %v2839_v26, %v1004_v28  ;;  %v3432_v26 = vld [vmem:[#allocation2 + $0x4f8] ss:$88 sps:$4 sm:$0xff]   ;;  %1673 = vmatprep.subr.bf16.mxu1 %v3437_v6  ;;  %v2860_v6 = vld [vmem:[%s4056_s3 + $0xe] ss:$0 sm:$0xff] }
 0x8e7   :  { %v3435_v28 = vld [vmem:[#allocation2 + $0x500] ss:$88 sps:$4 sm:$0xff]  }
 0x8e8   :  { %v3837_v35 = vadd.f32 %v2840_v32, %v1012_v33 }
 0x8ea   :  { %v1037_v36 = vpack.c.bf16 %v3837_v35, %v1019_v34 }
 0x8ec   :  { %3155 = vmatmul.mubr.bf16.vlgmr.msra.gmra.mxu0 %v1037_v36 }
 0x8ed   :  { %1662 = vmatprep.mubr.bf16.mxu0 %v3644_v42  ;;  %1631 = vmatpush1.bf16.msra.mxu0 %v3432_v26 }
 0x8ee   :  { %1632 = vmatprep.subr.bf16.mxu0 %v3440_v41  ;;  %v3489_v41 = vld [vmem:[#allocation2 + $0x2f8] ss:$88 sps:$4 sm:$0xff]  }
 0x8f1   :  { %1633 = vmatpush1.bf16.msra.mxu0 %v3438_v30  ;;  %v3494_v30 = vld [vmem:[#allocation2 + $0x24c] ss:$88 sps:$4 sm:$0xff]  }
 0x9ac   :  { %v1127_v45 = vpop.f32.mrf.mxu0 }
 0x9ad   :  { %v1128_v47 = vadd.f32 %v2841_v44, %v1127_v45  ;;  %v3446_v45 = vld [vmem:[#allocation2 + $0x39c] ss:$88 sps:$4 sm:$0xff]  }
 0x9ae   :  { %v3156_v48 = vpop.f32.mrf.mxu0  ;;  %1634 = vmatprep.subr.bf16.mxu0 %v3446_v45  ;;  %v3495_v45 = vld [vmem:[#allocation2 + $0x198] ss:$88 sps:$4 sm:$0xff]  }
 0x9af   :  { %v1136_v49 = vmul.f32 0.044715, %v1128_v47  ;;  %v1134_v1 = vmul.f32 0.5, %v1128_v47  ;;  %v3449_v48 = vld [vmem:[#allocation2 + $0x3a4] ss:$88 sps:$4 sm:$0xff]  }
 0x9b0   :  { %v1130_v51 = vpop.f32.mrf.mxu0 }
 0x9b1   :  { %v1138_v52 = vmul.f32 %v1136_v49, %v1128_v47  ;;  %v1131_v53 = vadd.f32 %v2841_v44, %v1130_v51  ;;  %v3441_v44 = vld [vmem:[#allocation2 + $0x450] ss:$88 sps:$4 sm:$0xff]   ;;  %v3447_v49 = vld [vmem:[#allocation2 + $0x3a0] ss:$88 sps:$4 sm:$0xff]  }
 0x9b2   :  { %v3157_v54 = vpop.f32.mrf.mxu0  ;;  %v3450_v51 = vld [vmem:[#allocation2 + $0x2e8] ss:$88 sps:$4 sm:$0xff]  }
 0x9b3   :  { %v1140_v55 = vmul.f32 %v1138_v52, %v1128_v47  ;;  %v1137_v56 = vmul.f32 0.044715, %v1131_v53  ;;  %v1135_v3 = vmul.f32 0.5, %v1131_v53  ;;  %v3452_v52 = vld [vmem:[#allocation2 + $0x2ec] ss:$88 sps:$4 sm:$0xff]  }
 0x9b4   :  { %v3455_v54 = vld [vmem:[#allocation2 + $0x2f4] ss:$88 sps:$4 sm:$0xff]  }
 0x9b5   :  { %v1142_v57 = vadd.f32 %v1140_v55, %v1128_v47  ;;  %v1139_v58 = vmul.f32 %v1137_v56, %v1131_v53  ;;  %v3444_v47 = vld [vmem:[#allocation2 + $0x398] ss:$88 sps:$4 sm:$0xff]   ;;  %v3458_v55 = vld [vmem:[#allocation2 + $0x23c] ss:$88 sps:$4 sm:$0xff]  }
 0x9b6   :  { %1635 = vmatpush1.bf16.msra.mxu0 %v3444_v47  ;;  %v3461_v56 = vld [vmem:[#allocation2 + $0x244] ss:$88 sps:$4 sm:$0xff]   ;;  %v3498_v47 = vld [vmem:[#allocation2 + $0xe8] ss:$88 sps:$4 sm:$0xff]  }
 0x9b7   :  { %v1144_v59 = vmul.f32 0.7978846, %v1142_v57  ;;  %v1141_v60 = vmul.f32 %v1139_v58, %v1131_v53  ;;  %1636 = vmatprep.subr.bf16.mxu0 %v3452_v52  ;;  %v3456_v57 = vld [vmem:[#allocation2 + $0x238] ss:$88 sps:$4 sm:$0xff]  }
 0x9b8   :  { %v3459_v58 = vld [vmem:[#allocation2 + $0x240] ss:$88 sps:$4 sm:$0xff]   ;;  %v3890_v52 = vld [vmem:[%s4056_s3 + $0xf] sm:$0x3f] }
 0x9b9   :  { %3576 = vtanh.f32 %v1144_v59  ;;  %v1143_v61 = vadd.f32 %v1141_v60, %v1131_v53  ;;  %v3453_v53 = vld [vmem:[#allocation2 + $0x2f0] ss:$88 sps:$4 sm:$0xff]   ;;  %v3464_v59 = vld [vmem:[#allocation2 + $0x18c] ss:$88 sps:$4 sm:$0xff]  }
 0x9ba   :  { %1637 = vmatpush1.bf16.msra.mxu0 %v3450_v51  ;;  %v3467_v60 = vld [vmem:[#allocation2 + $0x194] ss:$88 sps:$4 sm:$0xff]  }
 0x9bb   :  { %v1145_v62 = vmul.f32 0.7978846, %v1143_v61  ;;  %1638 = vmatprep.subr.bf16.mxu0 %v3458_v55  ;;  %v3462_v61 = vld [vmem:[#allocation2 + $0x188] ss:$88 sps:$4 sm:$0xff]   ;;  %v1367_v55 = vrot.slane %v3890_v52, %v140_v22 }
 0x9bd   :  { %3578 = vtanh.f32 %v1145_v62  ;;  %v3465_v62 = vld [vmem:[#allocation2 + $0x190] ss:$88 sps:$4 sm:$0xff]  }
 0x9be   :  { %1639 = vmatpush1.bf16.msra.mxu0 %v3456_v57 }
 0x9bf   :  { %1640 = vmatprep.subr.bf16.mxu0 %v3464_v59 }
 0x9c2   :  { %1641 = vmatpush1.bf16.msra.mxu0 %v3462_v61 }
 0x9c6   :  { %v3577_v63 = vpop.eup %3576 }
 0x9c7   :  { %v1148_v0 = vadd.f32 1.0, %v3577_v63  ;;  %v3470_v63 = vld [vmem:[#allocation2 + $0xdc] ss:$88 sps:$4 sm:$0xff]  }
 0x9c8   :  { %1642 = vmatprep.subr.bf16.mxu0 %v3470_v63 }
 0x9c9   :  { %v1150_v5 = vmul.f32 %v1148_v0, %v1134_v1  ;;  %v3473_v0 = vld [vmem:[#allocation2 + $0xe4] ss:$88 sps:$4 sm:$0xff]   ;;  %v3471_v1 = vld [vmem:[#allocation2 + $0xe0] ss:$88 sps:$4 sm:$0xff]  }
 0x9ca   :  { %v3579_v2 = vpop.eup %3578 }
 0x9cb   :  { %v1149_v4 = vadd.f32 1.0, %v3579_v2  ;;  %v3468_v2 = vld [vmem:[#allocation2 + $0xd8] ss:$88 sps:$4 sm:$0xff]  }
 0x9cc   :  { %1643 = vmatpush1.bf16.msra.mxu0 %v3468_v2 }
 0x9cd   :  { %v1151_v7 = vmul.f32 %v1149_v4, %v1135_v3  ;;  %v3476_v3 = vld [vmem:[#allocation2 + $0x2c] ss:$88 sps:$4 sm:$0xff]  }
 0x9ce   :  { %v3479_v4 = vld [vmem:[#allocation2 + $0x34] ss:$88 sps:$4 sm:$0xff]   ;;  %1644 = vmatprep.subr.bf16.mxu0 %v3476_v3 }
 0x9cf   :  { %v1168_v8 = vpack.c.bf16 %v1151_v7, %v1150_v5  ;;  %v3474_v5 = vld [vmem:[#allocation2 + $0x28] ss:$88 sps:$4 sm:$0xff]  }
 0x9d0   :  { %v3477_v7 = vld [vmem:[#allocation2 + $0x30] ss:$88 sps:$4 sm:$0xff]   ;;  %1645 = vmatpush1.bf16.msra.mxu0 %v3474_v5 }
 0x9d1   :  { %3175 = vmatmul.mubr.bf16.vlgmr.msra.gmra.mxu1 %v1168_v8  ;;  %v3482_v8 = vld [vmem:[#allocation2 + $0x50c] ss:$88 sps:$4 sm:$0xff]  }
 0x9d2   :  { %1705 = vmatprep.mubr.bf16.mxu1 %v3644_v42  ;;  %1674 = vmatpush1.bf16.msra.mxu1 %v3435_v28 }
 0x9d3   :  { %1675 = vmatprep.subr.bf16.mxu1 %v3443_v43  ;;  %1716 = vmatprep.subr.bf16.mxu0 %v3482_v8  ;;  %v3492_v43 = vld [vmem:[#allocation2 + $0x248] ss:$88 sps:$4 sm:$0xff]  }
 0x9d6   :  { %1676 = vmatpush1.bf16.msra.mxu1 %v3441_v44  ;;  %v3497_v44 = vld [vmem:[#allocation2 + $0x19c] ss:$88 sps:$4 sm:$0xff]  }
 0x9d7   :  { %1677 = vmatprep.subr.bf16.mxu1 %v3449_v48  ;;  %v3503_v48 = vld [vmem:[#allocation2 + $0x3c] ss:$88 sps:$4 sm:$0xff]  }
 0x9da   :  { %1678 = vmatpush1.bf16.msra.mxu1 %v3447_v49  ;;  %v3501_v49 = vld [vmem:[#allocation2 + $0x38] ss:$88 sps:$4 sm:$0xff]  }
 0x9db   :  { %1679 = vmatprep.subr.bf16.mxu1 %v3455_v54 }
 0x9de   :  { %1680 = vmatpush1.bf16.msra.mxu1 %v3453_v53 }
 0x9df   :  { %1681 = vmatprep.subr.bf16.mxu1 %v3461_v56 }
 0x9e2   :  { %1682 = vmatpush1.bf16.msra.mxu1 %v3459_v58 }
 0x9e3   :  { %1683 = vmatprep.subr.bf16.mxu1 %v3467_v60 }
 0x9e6   :  { %1684 = vmatpush1.bf16.msra.mxu1 %v3465_v62  ;;  %v1363_v62 = vrot.slane %v3890_v52, %v136_v29 }
 0x9e7   :  { %1685 = vmatprep.subr.bf16.mxu1 %v3473_v0  ;;  %v1371_v0 = vrot.slane %v3890_v52, %v144_v31 }
 0x9ea   :  { %1686 = vmatpush1.bf16.msra.mxu1 %v3471_v1 }
 0x9eb   :  { %1687 = vmatprep.subr.bf16.mxu1 %v3479_v4 }
 0x9ee   :  { %1688 = vmatpush1.bf16.msra.mxu1 %v3477_v7 }
 0x9ef   :  { %3178 = vmatprep.subr.bf16.mxu1 %v3643_v10 }
 0xa91   :  { %v1258_v13 = vpop.f32.mrf.mxu1 }
 0xa92   :  { %v1259_v14 = vadd.f32 %v2850_v12, %v1258_v13 }
 0xa93   :  { %v3176_v15 = vpop.f32.mrf.mxu1 }
 0xa94   :  { %v1265_v16 = vadd.f32 %v1259_v14, %v1019_v34 }
 0xa95   :  { %v1261_v18 = vpop.f32.mrf.mxu1 }
 0xa96   :  { %v1262_v19 = vadd.f32 %v2850_v12, %v1261_v18  ;;  %1269 = vadd.xlane.f32.xlu0 %v1265_v16 }
 0xa97   :  { %v3177_v20 = vpop.f32.mrf.mxu1 }
 0xa98   :  { %v1266_v25 = vadd.f32 %v1262_v19, %v3837_v35 }
 0xa9a   :  { %1271 = vadd.xlane.f32.xlu1 %v1266_v25 }
 0xb1f   :  { %v1270_v32 = vpop.xlane.xlu0 %1269 }
 0xb20   :  { %v1273_v33 = vmul.f32 0.03125, %v1270_v32 }
 0xb22   :  { %v1275_v36 = vsub.f32 %v1265_v16, %v1273_v33 }
 0xb23   :  { %v1272_v37 = vpop.xlane.xlu1 %1271 }
 0xb24   :  { %v1274_v34 = vmul.f32 0.03125, %v1272_v37  ;;  %v3857_v38 = vmul.f32 %v3682_v11, %v1275_v36  ;;  %v3480_v37 = vld [vmem:[#allocation2 + $0x508] ss:$88 sps:$4 sm:$0xff]  }
 0xb26   :  { %v1276_v24 = vsub.f32 %v1266_v25, %v1274_v34  ;;  %v1279_v35 = vmul.f32 %v3857_v38, %v3857_v38  ;;  %v2859_v25 = vld [vmem:[%s4056_s3 + $0xd] ss:$0 sm:$0xff] }
 0xb28   :  { %1281 = vadd.xlane.f32.xlu0 %v1279_v35  ;;  %v3862_v39 = vmul.f32 %v3682_v11, %v1276_v24  ;;  %v3483_v24 = vld [vmem:[#allocation2 + $0x458] ss:$88 sps:$4 sm:$0xff]   ;;  %v3488_v35 = vld [vmem:[#allocation2 + $0x3ac] ss:$88 sps:$4 sm:$0xff]  }
 0xb2a   :  { %v1280_v40 = vmul.f32 %v3862_v39, %v3862_v39 }
 0xb2c   :  { %1283 = vadd.xlane.f32.xlu1 %v1280_v40  ;;  %v3491_v40 = vld [vmem:[#allocation2 + $0x2fc] ss:$88 sps:$4 sm:$0xff]  }
 0xbb1   :  { %v1282_v12 = vpop.xlane.xlu0 %1281 }
 0xbb2   :  { %v1285_v13 = vmul.f32 0.03125, %v1282_v12 }
 0xbb4   :  { %v1287_v14 = vadd.f32 1e-12, %v1285_v13 }
 0xbb5   :  { %v1284_v15 = vpop.xlane.xlu1 %1283 }
 0xbb6   :  { %3580 = vrsqrt.f32 %v1287_v14  ;;  %v1286_v16 = vmul.f32 0.03125, %v1284_v15 }
 0xbb8   :  { %v1288_v18 = vadd.f32 1e-12, %v1286_v16 }
 0xbba   :  { %3582 = vrsqrt.f32 %v1288_v18 }
 0xbc3   :  { %v3581_v19 = vpop.eup %3580 }
 0xbc4   :  { %v1291_v20 = vmul.f32 %v3581_v19, %v3857_v38  ;;  %v3485_v38 = vld [vmem:[#allocation2 + $0x45c] ss:$88 sps:$4 sm:$0xff]  }
 0xbc6   :  { %v1299_v28 = vmul.f32 %v2859_v25, %v1291_v20 }
 0xbc7   :  { %v3583_v26 = vpop.eup %3582 }
 0xbc8   :  { %v1292_v27 = vmul.f32 %v3583_v26, %v3862_v39  ;;  %v3875_v33 = vadd.f32 %v2860_v6, %v1299_v28  ;;  %v3486_v39 = vld [vmem:[#allocation2 + $0x3a8] ss:$88 sps:$4 sm:$0xff]  }
 0xbca   :  { %v1300_v32 = vmul.f32 %v2859_v25, %v1292_v27 }
 0xbcc   :  { %v3877_v36 = vadd.f32 %v2860_v6, %v1300_v32 }
 0xbce   :  { %v1357_v34 = vpack.c.bf16 %v3877_v36, %v3875_v33 }
 0xbd0   :  { %1663 = vmatmul.mubr.bf16.vlgmr.msra.gmra.mxu0 %v1357_v34  ;;  %1706 = vmatmul.mubr.bf16.vlgmr.msra.gmra.mxu1 %v1357_v34 }
 0xbd1   :  { %1717 = vmatpush1.bf16.msra.mxu0 %v3480_v37  ;;  %1748 = vmatprep.mubr.bf16.mxu0 %v3644_v42  ;;  %v3500_v42 = vld [vmem:[#allocation2 + $0xec] ss:$88 sps:$4 sm:$0xff]  }
 0xbd2   :  { %1718 = vmatprep.subr.bf16.mxu0 %v3485_v38  ;;  %3180 = vmatprep.mubr.msk.bf16.mxu1 %vm3645_vm1, %v3643_v10 }
 0xbd5   :  { %1719 = vmatpush1.bf16.msra.mxu0 %v3483_v24 }
 0xbd6   :  { %1720 = vmatprep.subr.bf16.mxu0 %v3488_v35 }
 0xbd9   :  { %1721 = vmatpush1.bf16.msra.mxu0 %v3486_v39  ;;  %v1379_v39 = vrot.slane %v3890_v52, %v152_v9 }
 0xbda   :  { %1722 = vmatprep.subr.bf16.mxu0 %v3491_v40 }
 0xbdd   :  { %1723 = vmatpush1.bf16.msra.mxu0 %v3489_v41 }
 0xbde   :  { %1724 = vmatprep.subr.bf16.mxu0 %v3494_v30 }
 0xbe1   :  { %1725 = vmatpush1.bf16.msra.mxu0 %v3492_v43 }
 0xbe2   :  { %1726 = vmatprep.subr.bf16.mxu0 %v3497_v44 }
 0xbe5   :  { %1727 = vmatpush1.bf16.msra.mxu0 %v3495_v45 }
 0xbe6   :  { %1728 = vmatprep.subr.bf16.mxu0 %v3500_v42 }
 0xbe9   :  { %1729 = vmatpush1.bf16.msra.mxu0 %v3498_v47  ;;  %v1375_v47 = vrot.slane %v3890_v52, %v148_v17 }
 0xbea   :  { %1730 = vmatprep.subr.bf16.mxu0 %v3503_v48 }
 0xbed   :  { %1731 = vmatpush1.bf16.msra.mxu0 %v3501_v49  ;;  %v1383_v49 = vrot.slane %v3890_v52, %v156_v23 }
 0xbee   :  { %3202 = vmatprep.subr.bf16.mxu0 %v3643_v10 }
 0xbf0   :  { %1749 = vmatmul.mubr.bf16.vlgmr.msra.gmra.mxu0 %v1357_v34 }
 0xbf1   :  { %3218 = vmatprep.mubr.msk.bf16.mxu0 %vm3645_vm1, %v3643_v10 }
 0xc90   :  { %v1664_v51 = vpop.f32.mrf.mxu0  ;;  %v1707_v53 = vpop.f32.mrf.mxu1 }
 0xc91   :  { %v1665_v1 = vadd.f32 %v1664_v51, %v1363_v62  ;;  %v1708_v3 = vadd.f32 %v1707_v53, %v1371_v0 }
 0xc92   :  { %v1666_v54 = vpop.f32.mrf.mxu0  ;;  %v3895_v57 = vpop.f32.mrf.mxu1 }
 0xc93   :  { %v1667_v59 = vadd.f32 %v1666_v54, %v1367_v55  ;;  %v1710_v53 = vadd.f32 %v3895_v57, %v1375_v47 }
 0xc94   :  { %v1668_v56 = vpop.f32.mrf.mxu0  ;;  %v1711_v63 = vpop.f32.mrf.mxu1 }
 0xc95   :  { %v1669_v2 = vadd.f32 %v1668_v56, %v1363_v62  ;;  %v1712_v22 = vadd.f32 %v1711_v63, %v1371_v0  ;;  %v3617_v0 = vld [vmem:[%s4054_s1 + $0x8] sm:$0xff] }
 0xc96   :  { %v1670_v58 = vpop.f32.mrf.mxu0  ;;  %v1713_v29 = vpop.f32.mrf.mxu1 }
 0xc97   :  { %v1671_v60 = vadd.f32 %v1670_v58, %v1367_v55  ;;  %v1759_v4 = vpack.c.bf16 %v1669_v2, %v1665_v1  ;;  %v1825_v5 = vpack.c.bf16 %v1712_v22, %v1708_v3  ;;  %v1714_v9 = vadd.f32 %v1713_v29, %v1375_v47 }
 0xc99   :  { %v1760_v61 = vpack.c.bf16 %v1671_v60, %v1667_v59  ;;  %v1887_v55 = vpack.c.bf16 %v1714_v9, %v1710_v53  ;;  %v3616_v59 = vld [vmem:[%s4054_s1] sm:$0xff] }
 0xc9b   :  { %3179 = vmatpush3.bf16.xpose.msra.mxu1 %v1760_v61 }
 0xc9c   :  { %3184 = vmatprep.subr.bf16.mxu1 %v3643_v10 }
 0xca2   :  { %3181 = vmatmul.mubr.bf16.vlgmr.msra.gmra.mxu1 %v1759_v4 }
 0xca3   :  { %3185 = vmatpush3.bf16.msra.mxu1 %v1825_v5  ;;  %3186 = vmatprep.mubr.msk.bf16.mxu1 %vm3645_vm1, %v3643_v10 }
 0xca4   :  { %3190 = vmatprep.subr.bf16.mxu1 %v3643_v10 }
 0xcb0   :  { %v1750_v34 = vpop.f32.mrf.mxu0 }
 0xcb1   :  { %v1751_v44 = vadd.f32 %v1750_v34, %v1379_v39  ;;  %v3505_v34 = vld [vmem:[#allocation2 + $0x460] ss:$88 sps:$4 sm:$0xff]  }
 0xcb2   :  { %v1752_v38 = vpop.f32.mrf.mxu0 }
 0xcb3   :  { %v1753_v54 = vadd.f32 %v1752_v38, %v1383_v49  ;;  %v3506_v38 = vld [vmem:[#allocation2 + $0x3b0] ss:$88 sps:$4 sm:$0xff]  }
 0xcb4   :  { %v1754_v24 = vpop.f32.mrf.mxu0 }
 0xcb5   :  { %v1755_v41 = vadd.f32 %v1754_v24, %v1379_v39  ;;  %v3507_v24 = vld [vmem:[#allocation2 + $0x300] ss:$88 sps:$4 sm:$0xff]  }
 0xcb6   :  { %v1756_v48 = vpop.f32.mrf.mxu0  ;;  %v3509_v39 = vld [vmem:[#allocation2 + $0x1a0] ss:$88 sps:$4 sm:$0xff]  }
 0xcb7   :  { %v1888_v42 = vpack.c.bf16 %v1755_v41, %v1751_v44  ;;  %v1757_v51 = vadd.f32 %v1756_v48, %v1383_v49  ;;  %v3511_v41 = vld [vmem:[#allocation2 + $0x40] ss:$88 sps:$4 sm:$0xff]  }
 0xcb9   :  { %v1953_v17 = vpack.c.bf16 %v1757_v51, %v1753_v54 }
 0xd62   :  { %v1795_v7 = vpop.f32.mrf.mxu1 }
 0xd63   :  { %v1796_v31 = vadd.f32 %v1795_v7, %v3746_v46 }
 0xd64   :  { %v3182_v8 = vpop.f32.mrf.mxu1 }
 0xd65   :  { %v1802_v12 = vsel %vm576_vm2, %v1796_v31, -inf }
 0xd66   :  { %1803 = vmax.xlane.f32.xlu0 %v1802_v12  ;;  %v1798_v13 = vpop.f32.mrf.mxu1 }
 0xd67   :  { %v1799_v14 = vadd.f32 %v1798_v13, %v3752_v50 }
 0xd68   :  { %v3183_v15 = vpop.f32.mrf.mxu1 }
 0xd69   :  { %v1805_v16 = vsel %vm576_vm2, %v1799_v14, -inf  ;;  %v3512_v15 = vld [vmem:[#allocation2 + $0x514] ss:$88 sps:$4 sm:$0xff]  }
 0xd6a   :  { %1806 = vmax.xlane.f32.xlu1 %v1805_v16  ;;  %3203 = vmatpush3.bf16.msra.mxu0 %v3512_v15  ;;  %v3513_v16 = vld [vmem:[#allocation2 + $0x464] ss:$88 sps:$4 sm:$0xff]  }
 0xd6b   :  { %3204 = vmatprep.subr.bf16.mxu0 %v3643_v10 }
 0xd6e   :  { %3205 = vmatpush3.bf16.msra.mxu0 %v3513_v16 }
 0xd6f   :  { %3206 = vmatprep.subr.bf16.mxu0 %v3643_v10 }
 0xdef   :  { %v1804_v18 = vpop.xlane.xlu0 %1803 }
 0xdf0   :  { %v1808_v19 = vsub.f32 %v1796_v31, %v1804_v18  ;;  %v3514_v18 = vld [vmem:[#allocation2 + $0x3b4] ss:$88 sps:$4 sm:$0xff]  }
 0xdf1   :  { %3207 = vmatpush3.bf16.msra.mxu0 %v3514_v18 }
 0xdf2   :  { %v1810_v20 = vmul.f32 1.442695, %v1808_v19  ;;  %v3515_v19 = vld [vmem:[#allocation2 + $0x304] ss:$88 sps:$4 sm:$0xff]   ;;  %3208 = vmatprep.subr.bf16.mxu0 %v3643_v10 }
 0xdf3   :  { %v1807_v25 = vpop.xlane.xlu1 %1806 }
 0xdf4   :  { %3584 = vpow2.f32 %v1810_v20  ;;  %v1809_v26 = vsub.f32 %v1799_v14, %v1807_v25  ;;  %v3516_v20 = vld [vmem:[#allocation2 + $0x254] ss:$88 sps:$4 sm:$0xff]   ;;  %v3517_v25 = vld [vmem:[#allocation2 + $0x1a4] ss:$88 sps:$4 sm:$0xff]  }
 0xdf5   :  { %3209 = vmatpush3.bf16.msra.mxu0 %v3515_v19 }
 0xdf6   :  { %v1812_v27 = vmul.f32 1.442695, %v1809_v26  ;;  %3210 = vmatprep.subr.bf16.mxu0 %v3643_v10 }
 0xdf8   :  { %3586 = vpow2.f32 %v1812_v27 }
 0xdf9   :  { %3211 = vmatpush3.bf16.msra.mxu0 %v3516_v20 }
 0xdfa   :  { %3212 = vmatprep.subr.bf16.mxu0 %v3643_v10 }
 0xdfd   :  { %3213 = vmatpush3.bf16.msra.mxu0 %v3517_v25 }
 0xdfe   :  { %3214 = vmatprep.subr.bf16.mxu0 %v3643_v10 }
 0xe01   :  { %v3585_v46 = vpop.eup %3584 }
 0xe02   :  { %v1814_v28 = vsel %vm576_vm2, %v3585_v46, 0.0 }
 0xe03   :  { %1815 = vadd.xlane.f32.xlu0 %v1814_v28 }
 0xe05   :  { %v3587_v6 = vpop.eup %3586 }
 0xe06   :  { %v1817_v32 = vsel %vm576_vm2, %v3587_v6, 0.0 }
 0xe07   :  { %1818 = vadd.xlane.f32.xlu1 %v1817_v32 }
 0xe8c   :  { %v1816_v50 = vpop.xlane.xlu0 %1815 }
 0xe8d   :  { %3588 = vrcp.f32 %v1816_v50  ;;  %v3504_v50 = vld [vmem:[#allocation2 + $0x510] ss:$88 sps:$4 sm:$0xff]  }
 0xe90   :  { %v1819_v37 = vpop.xlane.xlu1 %1818 }
 0xe91   :  { %3590 = vrcp.f32 %v1819_v37 }
 0xe9a   :  { %v3589_v35 = vpop.eup %3588 }
 0xe9b   :  { %v1822_v30 = vmul.f32 %v3589_v35, %v3585_v46  ;;  %v3508_v35 = vld [vmem:[#allocation2 + $0x250] ss:$88 sps:$4 sm:$0xff]  }
 0xe9e   :  { %v3591_v40 = vpop.eup %3590 }
 0xe9f   :  { %v1823_v43 = vmul.f32 %v3591_v40, %v3587_v6  ;;  %v3510_v40 = vld [vmem:[#allocation2 + $0xf0] ss:$88 sps:$4 sm:$0xff]  }
 0xea1   :  { %v1824_v45 = vpack.c.bf16 %v1823_v43, %v1822_v30  ;;  %v3518_v30 = vld [vmem:[#allocation2 + $0xf4] ss:$88 sps:$4 sm:$0xff]   ;;  %v3519_v43 = vld [vmem:[#allocation2 + $0x44] ss:$88 sps:$4 sm:$0xff]  }
 0xea2   :  { %3215 = vmatpush3.bf16.msra.mxu0 %v3518_v30  ;;  %v3533_v30 = vld [vmem:[#allocation2 + $0x1ac] ss:$88 sps:$4 sm:$0xff]  }
 0xea3   :  { %3187 = vmatmul.mubr.msk.bf16.vlgmr.msra.gmra.mxu1 %vm576_vm2, %v1824_v45  ;;  %3216 = vmatprep.subr.bf16.mxu0 %v3643_v10 }
 0xea4   :  { %3191 = vmatpush3.bf16.xpose.msra.mxu1 %v1888_v42  ;;  %3192 = vmatprep.mubr.msk.bf16.mxu1 %vm3645_vm1, %v3643_v10 }
 0xea5   :  { %3196 = vmatprep.subr.bf16.mxu1 %v3643_v10 }
 0xea6   :  { %3217 = vmatpush3.bf16.msra.mxu0 %v3519_v43  ;;  %v3534_v43 = vld [vmem:[#allocation2 + $0xfc] ss:$88 sps:$4 sm:$0xff]  }
 0xea7   :  { %3242 = vmatprep.subr.bf16.mxu0 %v3643_v10 }
 0xeab   :  { %3193 = vmatmul.mubr.bf16.vlgmr.msra.gmra.mxu1 %v1887_v55  ;;  %v2927_v55 = vld [vmem:[%s4056_s3 + $0x15] ss:$0 sm:$0xff] }
 0xeac   :  { %3197 = vmatpush3.bf16.msra.mxu1 %v1953_v17  ;;  %3198 = vmatprep.mubr.msk.bf16.mxu1 %vm3645_vm1, %v3643_v10 }
 0xead   :  { %3222 = vmatprep.subr.bf16.mxu1 %v3643_v10 }
 0xf63   :  { %v3930_v21 = vpop.f32.mrf.mxu1 }
 0xf65   :  { %v3188_v23 = vpop.f32.mrf.mxu1 }
 0xf67   :  { %v3932_v52 = vpop.f32.mrf.mxu1 }
 0xf68   :  { %v1886_v56 = vpack.c.bf16 %v3932_v52, %v3930_v21 }
 0xf69   :  { %v3189_v58 = vpop.f32.mrf.mxu1 }
 0xf6b   :  { %v1923_v57 = vpop.f32.mrf.mxu1 }
 0xf6c   :  { %v1924_v60 = vadd.f32 %v3616_v59, %v1923_v57 }
 0xf6d   :  { %v3194_v61 = vpop.f32.mrf.mxu1 }
 0xf6e   :  { %v1930_v62 = vsel %vm576_vm2, %v1924_v60, -inf  ;;  %v3520_v61 = vld [vmem:[#allocation2 + $0x518] ss:$88 sps:$4 sm:$0xff]  }
 0xf6f   :  { %1931 = vmax.xlane.f32.xlu0 %v1930_v62  ;;  %v1926_v63 = vpop.f32.mrf.mxu1 }
 0xf70   :  { %v1927_v2 = vadd.f32 %v3617_v0, %v1926_v63 }
 0xf71   :  { %v3195_v22 = vpop.f32.mrf.mxu1 }
 0xf72   :  { %v1933_v1 = vsel %vm576_vm2, %v1927_v2, -inf }
 0xf73   :  { %1934 = vmax.xlane.f32.xlu1 %v1933_v1 }
 0xff8   :  { %v1932_v3 = vpop.xlane.xlu0 %1931 }
 0xff9   :  { %v1936_v4 = vsub.f32 %v1924_v60, %v1932_v3 }
 0xffb   :  { %v1938_v5 = vmul.f32 1.442695, %v1936_v4 }
 0xffc   :  { %v1935_v29 = vpop.xlane.xlu1 %1934 }
 0xffd   :  { %3592 = vpow2.f32 %v1938_v5  ;;  %v1937_v7 = vsub.f32 %v1927_v2, %v1935_v29  ;;  %v3522_v29 = vld [vmem:[#allocation2 + $0x3b8] ss:$88 sps:$4 sm:$0xff]  }
 0xfff   :  { %v1940_v31 = vmul.f32 1.442695, %v1937_v7  ;;  %v3523_v7 = vld [vmem:[#allocation2 + $0x308] ss:$88 sps:$4 sm:$0xff]  }
0x1001   :  { %3594 = vpow2.f32 %v1940_v31  ;;  %v3524_v31 = vld [vmem:[#allocation2 + $0x258] ss:$88 sps:$4 sm:$0xff]  }
0x100a   :  { %v3593_v8 = vpop.eup %3592 }
0x100b   :  { %v1942_v12 = vsel %vm576_vm2, %v3593_v8, 0.0 }
0x100c   :  { %1943 = vadd.xlane.f32.xlu0 %v1942_v12  ;;  %v3526_v12 = vld [vmem:[#allocation2 + $0xf8] ss:$88 sps:$4 sm:$0xff]  }
0x100e   :  { %v3595_v13 = vpop.eup %3594 }
0x100f   :  { %v1945_v14 = vsel %vm576_vm2, %v3595_v13, 0.0 }
0x1010   :  { %1946 = vadd.xlane.f32.xlu1 %v1945_v14 }
0x1095   :  { %v1944_v26 = vpop.xlane.xlu0 %1943 }
0x1096   :  { %3596 = vrcp.f32 %v1944_v26 }
0x1099   :  { %v1947_v27 = vpop.xlane.xlu1 %1946 }
0x109a   :  { %3598 = vrcp.f32 %v1947_v27  ;;  %v2928_v27 = vld [vmem:[%s4056_s3 + $0x16] ss:$0 sm:$0xff] }
0x10a3   :  { %v3597_v46 = vpop.eup %3596 }
0x10a4   :  { %v1950_v6 = vmul.f32 %v3597_v46, %v3593_v8  ;;  %v3525_v8 = vld [vmem:[#allocation2 + $0x1a8] ss:$88 sps:$4 sm:$0xff]  }
0x10a7   :  { %v3599_v28 = vpop.eup %3598 }
0x10a8   :  { %v1951_v32 = vmul.f32 %v3599_v28, %v3595_v13  ;;  %v3527_v13 = vld [vmem:[#allocation2 + $0x48] ss:$88 sps:$4 sm:$0xff]  }
0x10aa   :  { %v1952_v37 = vpack.c.bf16 %v1951_v32, %v1950_v6  ;;  %v2929_v32 = vld [vmem:[%s4056_s3 + $0x17] ss:$0 sm:$0xff] }
0x10ac   :  { %3199 = vmatmul.mubr.msk.bf16.vlgmr.msra.gmra.mxu1 %vm576_vm2, %v1952_v37 }
0x10ad   :  { %3223 = vmatpush3.bf16.msra.mxu1 %v3504_v50  ;;  %3238 = vmatprep.mubr.msk.bf16.mxu1 %vm3645_vm1, %v3643_v10 }
0x10ae   :  { %3224 = vmatprep.subr.bf16.mxu1 %v3643_v10 }
0x10b1   :  { %3225 = vmatpush3.bf16.msra.mxu1 %v3505_v34 }
0x10b2   :  { %3226 = vmatprep.subr.bf16.mxu1 %v3643_v10 }
0x10b5   :  { %3227 = vmatpush3.bf16.msra.mxu1 %v3506_v38 }
0x10b6   :  { %3228 = vmatprep.subr.bf16.mxu1 %v3643_v10 }
0x10b9   :  { %3229 = vmatpush3.bf16.msra.mxu1 %v3507_v24  ;;  %v3528_v24 = vld [vmem:[#allocation2 + $0x51c] ss:$88 sps:$4 sm:$0xff]  }
0x10ba   :  { %3230 = vmatprep.subr.bf16.mxu1 %v3643_v10 }
0x10bd   :  { %3231 = vmatpush3.bf16.msra.mxu1 %v3508_v35  ;;  %v3529_v35 = vld [vmem:[#allocation2 + $0x46c] ss:$88 sps:$4 sm:$0xff]  }
0x10be   :  { %3232 = vmatprep.subr.bf16.mxu1 %v3643_v10 }
0x10c1   :  { %3233 = vmatpush3.bf16.msra.mxu1 %v3509_v39  ;;  %v3530_v39 = vld [vmem:[#allocation2 + $0x3bc] ss:$88 sps:$4 sm:$0xff]  }
0x10c2   :  { %3234 = vmatprep.subr.bf16.mxu1 %v3643_v10 }
0x10c5   :  { %3235 = vmatpush3.bf16.msra.mxu1 %v3510_v40  ;;  %v3531_v40 = vld [vmem:[#allocation2 + $0x30c] ss:$88 sps:$4 sm:$0xff]  }
0x10c6   :  { %3236 = vmatprep.subr.bf16.mxu1 %v3643_v10 }
0x10c9   :  { %3237 = vmatpush3.bf16.msra.mxu1 %v3511_v41  ;;  %v3532_v41 = vld [vmem:[#allocation2 + $0x25c] ss:$88 sps:$4 sm:$0xff]  }
0x10ca   :  { %3262 = vmatprep.subr.bf16.mxu1 %v3643_v10 }
0x10cc   :  { %3239 = vmatmul.mubr.bf16.vlgmr.msra.gmra.mxu1 %v1886_v56 }
0x10cd   :  { %3278 = vmatprep.mubr.msk.bf16.mxu1 %vm3645_vm1, %v3643_v10  ;;  %3263 = vmatpush3.bf16.msra.mxu1 %v3528_v24 }
0x10ce   :  { %3264 = vmatprep.subr.bf16.mxu1 %v3643_v10 }
0x10d1   :  { %3265 = vmatpush3.bf16.msra.mxu1 %v3529_v35 }
0x10d2   :  { %3266 = vmatprep.subr.bf16.mxu1 %v3643_v10 }
0x10d5   :  { %3267 = vmatpush3.bf16.msra.mxu1 %v3530_v39 }
0x10d6   :  { %3268 = vmatprep.subr.bf16.mxu1 %v3643_v10 }
0x10d9   :  { %3269 = vmatpush3.bf16.msra.mxu1 %v3531_v40 }
0x10da   :  { %3270 = vmatprep.subr.bf16.mxu1 %v3643_v10 }
0x10dd   :  { %3271 = vmatpush3.bf16.msra.mxu1 %v3532_v41 }
0x10de   :  { %3272 = vmatprep.subr.bf16.mxu1 %v3643_v10 }
0x10e1   :  { %3273 = vmatpush3.bf16.msra.mxu1 %v3533_v30 }
0x10e2   :  { %3274 = vmatprep.subr.bf16.mxu1 %v3643_v10 }
0x10e5   :  { %3275 = vmatpush3.bf16.msra.mxu1 %v3534_v43 }
0x10e6   :  { %3276 = vmatprep.subr.bf16.mxu1 %v3643_v10 }
0x116c   :  { %v1991_v44 = vpop.f32.mrf.mxu1 }
0x116e   :  { %v3200_v45 = vpop.f32.mrf.mxu1 }
0x116f   :  { %v2930_v45 = vld [vmem:[%s4056_s3 + $0x18] ss:$0 sm:$0xff] }
0x1170   :  { %v1994_v42 = vpop.f32.mrf.mxu1 }
0x1171   :  { %v2014_v47 = vpack.c.bf16 %v1994_v42, %v1991_v44  ;;  %v3535_v44 = vld [vmem:[#allocation2 + $0x4c] ss:$88 sps:$4 sm:$0xff]  }
0x1172   :  { %v3201_v48 = vpop.f32.mrf.mxu1  ;;  %3277 = vmatpush3.bf16.msra.mxu1 %v3535_v44 }
0x1173   :  { %3219 = vmatmul.mubr.bf16.vlgmr.msra.gmra.mxu0 %v2014_v47  ;;  %3302 = vmatprep.subr.bf16.mxu1 %v3643_v10 }
0x1174   :  { %3258 = vmatprep.mubr.msk.bf16.mxu0 %vm3645_vm1, %v3643_v10  ;;  %3243 = vmatpush3.bf16.msra.mxu0 %v3520_v61 }
0x1175   :  { %3244 = vmatprep.subr.bf16.mxu0 %v3643_v10 }
0x118c   :  { %v2186_v49 = vpop.f32.mrf.mxu1 }
0x118e   :  { %v3240_v9 = vpop.f32.mrf.mxu1 }
0x1190   :  { %v2189_v51 = vpop.f32.mrf.mxu1 }
0x1192   :  { %v3241_v53 = vpop.f32.mrf.mxu1 }
0x1233   :  { %v2097_v54 = vpop.f32.mrf.mxu0 }
0x1234   :  { %v2187_v17 = vadd.f32 %v2186_v49, %v2097_v54 }
0x1235   :  { %v3220_v21 = vpop.f32.mrf.mxu0 }
0x1236   :  { %v2200_v23 = vadd.f32 %v2927_v55, %v2187_v17 }
0x1237   :  { %v2100_v52 = vpop.f32.mrf.mxu0 }
0x1238   :  { %v2190_v56 = vadd.f32 %v2189_v51, %v2100_v52  ;;  %v2202_v58 = vadd.f32 %v2200_v23, %v3875_v33 }
0x1239   :  { %v3221_v57 = vpop.f32.mrf.mxu0 }
0x123a   :  { %v2201_v59 = vadd.f32 %v2927_v55, %v2190_v56  ;;  %2206 = vadd.xlane.f32.xlu0 %v2202_v58 }
0x123c   :  { %v2203_v60 = vadd.f32 %v2201_v59, %v3877_v36  ;;  %v3521_v36 = vld [vmem:[#allocation2 + $0x468] ss:$88 sps:$4 sm:$0xff]  }
0x123d   :  { %3245 = vmatpush3.bf16.msra.mxu0 %v3521_v36 }
0x123e   :  { %2208 = vadd.xlane.f32.xlu1 %v2203_v60  ;;  %3246 = vmatprep.subr.bf16.mxu0 %v3643_v10 }
0x1241   :  { %3247 = vmatpush3.bf16.msra.mxu0 %v3522_v29 }
0x1242   :  { %3248 = vmatprep.subr.bf16.mxu0 %v3643_v10 }
0x1245   :  { %3249 = vmatpush3.bf16.msra.mxu0 %v3523_v7 }
0x1246   :  { %3250 = vmatprep.subr.bf16.mxu0 %v3643_v10 }
0x1249   :  { %3251 = vmatpush3.bf16.msra.mxu0 %v3524_v31 }
0x124a   :  { %3252 = vmatprep.subr.bf16.mxu0 %v3643_v10 }
0x124d   :  { %3253 = vmatpush3.bf16.msra.mxu0 %v3525_v8 }
0x124e   :  { %3254 = vmatprep.subr.bf16.mxu0 %v3643_v10 }
0x1251   :  { %3255 = vmatpush3.bf16.msra.mxu0 %v3526_v12  ;;  %v3536_v12 = vld [vmem:[#allocation2 + $0x520] ss:$88 sps:$4 sm:$0xff]  }
0x1252   :  { %3256 = vmatprep.subr.bf16.mxu0 %v3643_v10 }
0x1255   :  { %3257 = vmatpush3.bf16.msra.mxu0 %v3527_v13 }
0x1256   :  { %3282 = vmatprep.subr.bf16.mxu0 %v3643_v10 }
0x12c3   :  { %v2207_v62 = vpop.xlane.xlu0 %2206 }
0x12c4   :  { %v2210_v63 = vmul.f32 0.03125, %v2207_v62 }
0x12c6   :  { %v2212_v0 = vsub.f32 %v2202_v58, %v2210_v63 }
0x12c7   :  { %v2209_v2 = vpop.xlane.xlu1 %2208 }
0x12c8   :  { %v2211_v22 = vmul.f32 0.03125, %v2209_v2  ;;  %v2214_v1 = vmul.f32 %v3682_v11, %v2212_v0 }
0x12ca   :  { %v2213_v3 = vsub.f32 %v2203_v60, %v2211_v22  ;;  %v2216_v4 = vmul.f32 %v2214_v1, %v2214_v1 }
0x12cc   :  { %2218 = vadd.xlane.f32.xlu0 %v2216_v4  ;;  %v2215_v33 = vmul.f32 %v3682_v11, %v2213_v3  ;;  %v2939_v3 = vld [vmem:[%s4056_s3 + $0x19] ss:$0 sm:$0xff] }
0x12ce   :  { %v2217_v5 = vmul.f32 %v2215_v33, %v2215_v33 }
0x12d0   :  { %2220 = vadd.xlane.f32.xlu1 %v2217_v5 }
0x1355   :  { %v2219_v14 = vpop.xlane.xlu0 %2218 }
0x1356   :  { %v2222_v15 = vmul.f32 0.03125, %v2219_v14 }
0x1358   :  { %v2224_v16 = vadd.f32 1e-12, %v2222_v15 }
0x1359   :  { %v2221_v18 = vpop.xlane.xlu1 %2220 }
0x135a   :  { %3600 = vrsqrt.f32 %v2224_v16  ;;  %v2223_v19 = vmul.f32 0.03125, %v2221_v18 }
0x135c   :  { %v2225_v20 = vadd.f32 1e-12, %v2223_v19 }
0x135e   :  { %3602 = vrsqrt.f32 %v2225_v20 }
0x1367   :  { %v3601_v25 = vpop.eup %3600 }
0x1368   :  { %v2228_v26 = vmul.f32 %v3601_v25, %v2214_v1 }
0x136a   :  { %v2236_v6 = vmul.f32 %v2928_v27, %v2228_v26 }
0x136b   :  { %v3603_v46 = vpop.eup %3602 }
0x136c   :  { %v2229_v28 = vmul.f32 %v3603_v46, %v2215_v33  ;;  %v3993_v37 = vadd.f32 %v2929_v32, %v2236_v6  ;;  %v3537_v46 = vld [vmem:[#allocation2 + $0x470] ss:$88 sps:$4 sm:$0xff]  }
0x136d   :  { %v3539_v6 = vld [vmem:[#allocation2 + $0x310] ss:$88 sps:$4 sm:$0xff]  }
0x136e   :  { %v2237_v50 = vmul.f32 %v2928_v27, %v2229_v28  ;;  %v3538_v28 = vld [vmem:[#allocation2 + $0x3c0] ss:$88 sps:$4 sm:$0xff]  }
0x1370   :  { %v3995_v34 = vadd.f32 %v2929_v32, %v2237_v50  ;;  %v3540_v32 = vld [vmem:[#allocation2 + $0x260] ss:$88 sps:$4 sm:$0xff]   ;;  %v3541_v50 = vld [vmem:[#allocation2 + $0x1b0] ss:$88 sps:$4 sm:$0xff]  }
0x1372   :  { %v2262_v38 = vpack.c.bf16 %v3995_v34, %v3993_v37 }
0x1374   :  { %3259 = vmatmul.mubr.bf16.vlgmr.msra.gmra.mxu0 %v2262_v38  ;;  %v3545_v38 = vld [vmem:[#allocation2 + $0x474] ss:$88 sps:$4 sm:$0xff]  }
0x1375   :  { %3298 = vmatprep.mubr.msk.bf16.mxu0 %vm3645_vm1, %v3643_v10  ;;  %3283 = vmatpush3.bf16.msra.mxu0 %v3536_v12 }
0x1376   :  { %3284 = vmatprep.subr.bf16.mxu0 %v3643_v10 }
0x1379   :  { %3285 = vmatpush3.bf16.msra.mxu0 %v3537_v46 }
0x137a   :  { %3286 = vmatprep.subr.bf16.mxu0 %v3643_v10 }
0x137d   :  { %3287 = vmatpush3.bf16.msra.mxu0 %v3538_v28 }
0x137e   :  { %3288 = vmatprep.subr.bf16.mxu0 %v3643_v10 }
0x1381   :  { %3289 = vmatpush3.bf16.msra.mxu0 %v3539_v6 }
0x1382   :  { %3290 = vmatprep.subr.bf16.mxu0 %v3643_v10 }
0x1385   :  { %3291 = vmatpush3.bf16.msra.mxu0 %v3540_v32 }
0x1386   :  { %3292 = vmatprep.subr.bf16.mxu0 %v3643_v10 }
0x1389   :  { %3293 = vmatpush3.bf16.msra.mxu0 %v3541_v50 }
0x138a   :  { %3294 = vmatprep.subr.bf16.mxu0 %v3643_v10 }
0x1434   :  { %v2352_v42 = vpop.f32.mrf.mxu0 }
0x1435   :  { %v2353_v47 = vadd.f32 %v2930_v45, %v2352_v42 }
0x1436   :  { %v3260_v48 = vpop.f32.mrf.mxu0 }
0x1437   :  { %v2361_v49 = vmul.f32 0.044715, %v2353_v47  ;;  %v2359_v62 = vmul.f32 0.5, %v2353_v47 }
0x1438   :  { %v2355_v9 = vpop.f32.mrf.mxu0 }
0x1439   :  { %v2363_v51 = vmul.f32 %v2361_v49, %v2353_v47  ;;  %v2356_v53 = vadd.f32 %v2930_v45, %v2355_v9  ;;  %v2948_v45 = vld [vmem:[%s4056_s3 + $0x1a] ss:$0 sm:$0xff]  ;;  %v2949_v49 = vld [vmem:[%s4056_s3 + $0x1b] ss:$0 sm:$0xff] }
0x143a   :  { %v3261_v54 = vpop.f32.mrf.mxu0 }
0x143b   :  { %v2365_v55 = vmul.f32 %v2363_v51, %v2353_v47  ;;  %v2362_v17 = vmul.f32 0.044715, %v2356_v53  ;;  %v2360_v63 = vmul.f32 0.5, %v2356_v53 }
0x143d   :  { %v2367_v21 = vadd.f32 %v2365_v55, %v2353_v47  ;;  %v2364_v23 = vmul.f32 %v2362_v17, %v2356_v53  ;;  %v3546_v55 = vld [vmem:[#allocation2 + $0x3c4] ss:$88 sps:$4 sm:$0xff]   ;;  %v3547_v17 = vld [vmem:[#allocation2 + $0x314] ss:$88 sps:$4 sm:$0xff]  }
0x143f   :  { %v2369_v52 = vmul.f32 0.7978846, %v2367_v21  ;;  %v2366_v56 = vmul.f32 %v2364_v23, %v2356_v53  ;;  %v3548_v21 = vld [vmem:[#allocation2 + $0x264] ss:$88 sps:$4 sm:$0xff]   ;;  %v3549_v23 = vld [vmem:[#allocation2 + $0x1b4] ss:$88 sps:$4 sm:$0xff]  }
0x1441   :  { %3604 = vtanh.f32 %v2369_v52  ;;  %v2368_v58 = vadd.f32 %v2366_v56, %v2356_v53  ;;  %v3550_v52 = vld [vmem:[#allocation2 + $0x104] ss:$88 sps:$4 sm:$0xff]   ;;  %v3551_v56 = vld [vmem:[#allocation2 + $0x54] ss:$88 sps:$4 sm:$0xff]  }
0x1443   :  { %v2370_v57 = vmul.f32 0.7978846, %v2368_v58  ;;  %v2950_v58 = vld [vmem:[%s4056_s3 + $0x1c] ss:$0 sm:$0xff] }
0x1445   :  { %3606 = vtanh.f32 %v2370_v57 }
0x144e   :  { %v3605_v59 = vpop.eup %3604 }
0x144f   :  { %v2373_v60 = vadd.f32 1.0, %v3605_v59 }
0x1451   :  { %v2375_v2 = vmul.f32 %v2373_v60, %v2359_v62 }
0x1452   :  { %v3607_v61 = vpop.eup %3606 }
0x1453   :  { %v2374_v0 = vadd.f32 1.0, %v3607_v61 }
0x1455   :  { %v2376_v22 = vmul.f32 %v2374_v0, %v2360_v63 }
0x1457   :  { %v2393_v1 = vpack.c.bf16 %v2376_v22, %v2375_v2 }
0x1459   :  { %3279 = vmatmul.mubr.bf16.vlgmr.msra.gmra.mxu1 %v2393_v1 }
0x145a   :  { %3318 = vmatprep.mubr.msk.bf16.mxu1 %vm3645_vm1, %v3643_v10 }
0x1519   :  { %v2483_v4 = vpop.f32.mrf.mxu1 }
0x151a   :  { %v2484_v33 = vadd.f32 %v2939_v3, %v2483_v4 }
0x151b   :  { %v3280_v5 = vpop.f32.mrf.mxu1 }
0x151c   :  { %v2490_v36 = vadd.f32 %v2484_v33, %v3993_v37  ;;  %v3543_v37 = vld [vmem:[#allocation2 + $0x50] ss:$88 sps:$4 sm:$0xff]  }
0x151d   :  { %v2486_v29 = vpop.f32.mrf.mxu1 }
0x151e   :  { %v2487_v7 = vadd.f32 %v2939_v3, %v2486_v29  ;;  %2494 = vadd.xlane.f32.xlu0 %v2490_v36 }
0x151f   :  { %v3281_v31 = vpop.f32.mrf.mxu1 }
0x1520   :  { %v2491_v8 = vadd.f32 %v2487_v7, %v3995_v34  ;;  %v3544_v34 = vld [vmem:[#allocation2 + $0x524] ss:$88 sps:$4 sm:$0xff]  }
0x1521   :  { %3303 = vmatpush3.bf16.msra.mxu1 %v3544_v34 }
0x1522   :  { %2496 = vadd.xlane.f32.xlu1 %v2491_v8  ;;  %3304 = vmatprep.subr.bf16.mxu1 %v3643_v10 }
0x1525   :  { %3305 = vmatpush3.bf16.msra.mxu1 %v3545_v38 }
0x1526   :  { %3306 = vmatprep.subr.bf16.mxu1 %v3643_v10 }
0x1529   :  { %3307 = vmatpush3.bf16.msra.mxu1 %v3546_v55 }
0x152a   :  { %3308 = vmatprep.subr.bf16.mxu1 %v3643_v10 }
0x152d   :  { %3309 = vmatpush3.bf16.msra.mxu1 %v3547_v17 }
0x152e   :  { %3310 = vmatprep.subr.bf16.mxu1 %v3643_v10 }
0x1531   :  { %3311 = vmatpush3.bf16.msra.mxu1 %v3548_v21 }
0x1532   :  { %3312 = vmatprep.subr.bf16.mxu1 %v3643_v10 }
0x1535   :  { %3313 = vmatpush3.bf16.msra.mxu1 %v3549_v23 }
0x1536   :  { %3314 = vmatprep.subr.bf16.mxu1 %v3643_v10 }
0x1539   :  { %3315 = vmatpush3.bf16.msra.mxu1 %v3550_v52 }
0x153a   :  { %3316 = vmatprep.subr.bf16.mxu1 %v3643_v10 }
0x153d   :  { %3317 = vmatpush3.bf16.msra.mxu1 %v3551_v56 }
0x15a7   :  { %v2495_v13 = vpop.xlane.xlu0 %2494 }
0x15a8   :  { %v2498_v14 = vmul.f32 0.03125, %v2495_v13 }
0x15aa   :  { %v2500_v15 = vsub.f32 %v2490_v36, %v2498_v14 }
0x15ab   :  { %v2497_v16 = vpop.xlane.xlu1 %2496 }
0x15ac   :  { %v2499_v18 = vmul.f32 0.03125, %v2497_v16  ;;  %v2502_v19 = vmul.f32 %v3682_v11, %v2500_v15 }
0x15ae   :  { %v2501_v20 = vsub.f32 %v2491_v8, %v2499_v18  ;;  %v2504_v25 = vmul.f32 %v2502_v19, %v2502_v19 }
0x15b0   :  { %2506 = vadd.xlane.f32.xlu0 %v2504_v25  ;;  %v2503_v26 = vmul.f32 %v3682_v11, %v2501_v20  ;;  %v3542_v11 = vld [vmem:[#allocation2 + $0x100] ss:$88 sps:$4 sm:$0xff]  }
0x15b1   :  { %3295 = vmatpush3.bf16.msra.mxu0 %v3542_v11 }
0x15b2   :  { %v2505_v27 = vmul.f32 %v2503_v26, %v2503_v26  ;;  %3296 = vmatprep.subr.bf16.mxu0 %v3643_v10  ;;  %v2959_v10 = vld [vmem:[%s4056_s3 + $0x1d] ss:$0 sm:$0xff] }
0x15b4   :  { %2508 = vadd.xlane.f32.xlu1 %v2505_v27 }
0x15b5   :  { %3297 = vmatpush3.bf16.msra.mxu0 %v3543_v37 }
0x1639   :  { %v2507_v24 = vpop.xlane.xlu0 %2506 }
0x163a   :  { %v2510_v35 = vmul.f32 0.03125, %v2507_v24 }
0x163c   :  { %v2512_v39 = vadd.f32 1e-12, %v2510_v35 }
0x163d   :  { %v2509_v40 = vpop.xlane.xlu1 %2508 }
0x163e   :  { %3608 = vrsqrt.f32 %v2512_v39  ;;  %v2511_v41 = vmul.f32 0.03125, %v2509_v40 }
0x1640   :  { %v2513_v30 = vadd.f32 1e-12, %v2511_v41 }
0x1642   :  { %3610 = vrsqrt.f32 %v2513_v30 }
0x164b   :  { %v3609_v43 = vpop.eup %3608 }
0x164c   :  { %v2516_v44 = vmul.f32 %v3609_v43, %v2502_v19 }
0x164e   :  { %v2524_v48 = vmul.f32 %v2948_v45, %v2516_v44 }
0x164f   :  { %v3611_v42 = vpop.eup %3610 }
0x1650   :  { %v2517_v47 = vmul.f32 %v3611_v42, %v2503_v26  ;;  %v2532_v51 = vadd.f32 %v2949_v49, %v2524_v48 }
0x1652   :  { %v2525_v9 = vmul.f32 %v2948_v45, %v2517_v47 }
0x1654   :  { %v2533_v53 = vadd.f32 %v2949_v49, %v2525_v9 }
0x1656   :  { %v2550_v54 = vpack.c.bf16 %v2533_v53, %v2532_v51 }
0x1658   :  { %3299 = vmatmul.mubr.bf16.vlgmr.msra.gmra.mxu0 %v2550_v54 }
0x1718   :  { %v2640_v57 = vpop.f32.mrf.mxu0 }
0x1719   :  { %v2641_v59 = vadd.f32 %v2950_v58, %v2640_v57 }
0x171a   :  { %v3300_v60 = vpop.f32.mrf.mxu0 }
0x171b   :  { %3612 = vtanh.f32 %v2641_v59 }
0x171c   :  { %v2643_v61 = vpop.f32.mrf.mxu0 }
0x171d   :  { %v2644_v62 = vadd.f32 %v2950_v58, %v2643_v61 }
0x171e   :  { %v3301_v63 = vpop.f32.mrf.mxu0 }
0x171f   :  { %3614 = vtanh.f32 %v2644_v62 }
0x1728   :  { %v3613_v0 = vpop.eup %3612 }
0x172c   :  { %v3615_v2 = vpop.eup %3614 }
0x172d   :  { %v2665_v22 = vpack.c.bf16 %v3615_v2, %v3613_v0 }
0x172f   :  { %3319 = vmatmul.mubr.bf16.vlgmr.msra.gmra.mxu1 %v2665_v22 }
0x17ef   :  { %v2755_v1 = vpop.f32.mrf.mxu1 }
0x17f0   :  { %v2756_v3 = vadd.f32 %v2959_v10, %v2755_v1 }
0x17f1   :  { %v3320_v4 = vpop.f32.mrf.mxu1 }
0x17f2   :  { %2762 = vst [vmem:[%s4057_s4] sm:$0xff] %v2756_v3 }
0x17f3   :  { %v2758_v33 = vpop.f32.mrf.mxu1 }
0x17f4   :  { %v2759_v5 = vadd.f32 %v2959_v10, %v2758_v33 }
0x17f5   :  { %v3321_v36 = vpop.f32.mrf.mxu1 }
0x17f6   :  { %2763 = vst [vmem:[%s4057_s4 + $0x8] sm:$0xff] %v2759_v5 }
0x17f7   :  { %2768 = vsyncpa [#allocation3], 1 }

</bundles_post_ra>
